<compile_context>
chip_gen: v6e
topology: v6e:2x2x1
jax: 0.10.0
libtpu: 0.0.40
codegen_flags: <defaults>
</compile_context>

<pallas_src>
import functools
import math

import jax
import jax.numpy as jnp
from jax import lax
from jax.experimental import pallas as pl
from jax.experimental.pallas import tpu as pltpu


def _rms_norm(x, w, eps):
  # matches RMSNorm: x * rsqrt(mean(x*x, -1) + eps), then * weight (all f32)
  xf = x.astype(jnp.float32)
  ms = jnp.mean(xf * xf, axis=-1, keepdims=True)
  return (xf * lax.rsqrt(ms + eps)) * w


def _silu(x):
  return x * (1.0 / (1.0 + jnp.exp(-x)))


def _transformer_block_kernel(
    x_ref, wq_ref, wkv_ref, wo_ref, w13_ref, w2_ref, attn_nw_ref, ffn_nw_ref,
    out_ref,
    k_s, v_s, q_s,
    *, n_heads, n_kv_heads, head_dim, hidden_dim, k_top, tq, hc, eps):
  qi = pl.program_id(1)
  S = x_ref.shape[1]
  D = x_ref.shape[2]
  H, KV, hd = n_heads, n_kv_heads, head_dim
  n_chunks = H // hc
  f32 = jnp.float32
  bf16 = jnp.bfloat16
  neg_inf = f32(-jnp.inf)

  # ---- once per batch element: fused K/V projection, cached head-major bf16 --
  @pl.when(qi == 0)
  def _():
    xn = _rms_norm(x_ref[0], attn_nw_ref[...], eps).astype(bf16)       # (S, D)
    kv = jnp.dot(xn, wkv_ref[...], preferred_element_type=f32)         # (S, 2*KV*hd)
    for h in range(KV):
      k_s[h] = kv[:, h * hd:(h + 1) * hd].astype(bf16)
      v_s[h] = kv[:, (KV + h) * hd:(KV + h + 1) * hd].astype(bf16)

  row0 = pl.multiple_of(qi * tq, tq)
  if tq == S:
    x_tile = x_ref[0]                                                  # (TQ, D)
  else:
    x_tile = x_ref[0, pl.ds(row0, tq), :]

  # ---- per q-tile Q projection (no full-sequence Q scratch) -------------------
  xn_t = _rms_norm(x_tile, attn_nw_ref[...], eps).astype(bf16)         # (TQ, D)
  q_all = jnp.dot(xn_t, wq_ref[...], preferred_element_type=f32)       # (TQ, H*hd)
  for h in range(H):
    q_s[h] = q_all[:, h * hd:(h + 1) * hd].astype(bf16)

  # ---- masks shared by every head chunk (broadcast over the head axis) -------
  row = lax.broadcasted_iota(jnp.int32, (1, tq, S), 1) + row0
  col = lax.broadcasted_iota(jnp.int32, (1, tq, S), 2)
  causal_ok = col <= row
  # Unique, strictly-decreasing-in-column finite key for masked entries so one
  # row-max per top-k step selects them with ties broken toward the lowest
  # column (matches torch.topk on the -inf rows).  Assumes all real scores are
  # finite and > -1e30 and S << 1e6 so consecutive keys stay distinct in f32.
  masked_key = f32(-1e30) - col.astype(f32) * f32(1e24)

  inv_sqrt_hd = f32(1.0 / math.sqrt(hd))
  attn_out = jnp.zeros((tq, D), f32)

  for c in range(n_chunks):
    if n_chunks == 1:
      q3, k3, v3 = q_s[...], k_s[...], v_s[...]                        # (hc,*,hd)
    else:
      q3 = q_s[pl.ds(c * hc, hc)]
      k3 = k_s[pl.ds(c * hc, hc)]
      v3 = v_s[pl.ds(c * hc, hc)]

    # scores + causal mask, batched over the head chunk
    sc = jnp.einsum('hqd,hkd->hqk', q3, k3,
                    preferred_element_type=f32) * inv_sqrt_hd          # (hc,TQ,S)
    sc = jnp.where(causal_ok, sc, neg_inf)

    if k_top >= S:
      # topk selects every column -> plain causal softmax
      m = jnp.max(sc, axis=-1, keepdims=True)
      e = jnp.exp(sc - m)
    else:
      # top-k sparsification: scatter(topk) onto zeros, exactly like
      # torch.zeros_like(scores).scatter(-1, topk_indices, topk_scores).
      # One reduction per step, scatter accumulated in place (no `taken`).
      sel = jnp.where(causal_ok, sc, masked_key)
      scattered = jnp.zeros_like(sc)
      m0 = None
      for t in range(k_top):
        cur = jnp.max(sel, axis=-1, keepdims=True)
        if t == 0:
          m0 = cur                              # row max of the visible scores
        hit = sel == cur
        scattered = jnp.where(hit, sc, scattered)
        sel = jnp.where(hit, neg_inf, sel)
      # non-selected columns stay 0 and take softmax weight exp(-m) (module
      # semantics), so the softmax max is max(m0, 0).
      m = jnp.maximum(m0, f32(0.0))
      e = jnp.exp(scattered - m)                # exp(-inf - m) = 0 for masked picks

    denom = jnp.sum(e, axis=-1, keepdims=True)
    p = (e * pl.reciprocal(denom, approx=True)).astype(bf16)
    # attn_dropout p = 0.0 -> identity

    ctx = jnp.einsum('hqk,hkd->hqd', p, v3,
                     preferred_element_type=f32)                       # (hc,TQ,hd)
    # wo applied per head: attn_out += ctx[h] @ wo[h]  (no (TQ, H*hd) scratch)
    for h in range(hc):
      attn_out = attn_out + jnp.dot(ctx[h].astype(bf16), wo_ref[c * hc + h],
                                    preferred_element_type=f32)
  # resid_dropout p = 0.0 -> identity

  h_res = x_tile + attn_out                                            # (TQ, D) f32

  # ---- feed-forward: out = h + w2(silu(w1(hn)) * w3(hn)) ----------------------
  hn = _rms_norm(h_res, ffn_nw_ref[...], eps).astype(bf16)
  g = jnp.dot(hn, w13_ref[...], preferred_element_type=f32)            # (TQ, 2*hidden)
  a = g[:, :hidden_dim]
  b = g[:, hidden_dim:]
  ff = jnp.dot((_silu(a) * b).astype(bf16), w2_ref[...],
               preferred_element_type=f32)
  # FeedForward dropout p = 0.0 -> identity

  out_ref[0] = (h_res + ff).astype(out_ref.dtype)


def transformer_block(x, params, *, n_heads, n_kv_heads, topk, eps=1e-6):
  assert n_heads == n_kv_heads, "module's score matmul requires n_heads == n_kv_heads"
  B, S, D = x.shape
  head_dim = D // n_heads
  hidden_dim = params['w1_t'].shape[1]
  k_top = min(topk, S)
  assert k_top >= 1

  # VMEM capacity drives the q-tile size and the scoped limit
  # (v5e/v6e: 128 MiB physical, v7x: 64 MiB per core).
  try:
    vmem_cap = int(pltpu.get_tpu_info().vmem_capacity_bytes)
  except Exception:
    vmem_cap = 64 * 1024 * 1024        # conservative fallback (v7x-sized)
  vmem_limit = min(vmem_cap * 7 // 8, 112 * 1024 * 1024)

  if S <= 256:
    tq = S
  else:
    prefer = (256, 128) if vmem_cap > 96 * 1024 * 1024 else (128, 256)
    tq = next((c for c in prefer if S % c == 0), S)
  assert S % tq == 0

  # Head-chunk size bounds the (hc, tq, S) f32 score / top-k temporaries.
  if n_heads <= 8:
    hc = n_heads
  else:
    hc = next(c for c in (8, 4, 2, 1) if n_heads % c == 0)

  # Host-side weight prep: bf16 MXU operands; wk/wv fused, w1/w3 fused,
  # wo reshaped head-major for the per-head output projection.
  bf16 = jnp.bfloat16
  wq = params['wq_t'].astype(bf16)
  wkv = jnp.concatenate([params['wk_t'], params['wv_t']], axis=1).astype(bf16)
  wo3 = params['wo_t'].reshape(n_heads, head_dim, D).astype(bf16)
  w13 = jnp.concatenate([params['w1_t'], params['w3_t']], axis=1).astype(bf16)
  w2 = params['w2_t'].astype(bf16)

  kernel = functools.partial(
      _transformer_block_kernel,
      n_heads=n_heads, n_kv_heads=n_kv_heads, head_dim=head_dim,
      hidden_dim=hidden_dim, k_top=k_top, tq=tq, hc=hc, eps=eps)

  def full_spec(shape):
    return pl.BlockSpec(shape, lambda b, q, _n=len(shape): (0,) * _n)

  grid = (B, S // tq)

  return pl.pallas_call(
      kernel,
      out_shape=jax.ShapeDtypeStruct((B, S, D), x.dtype),
      grid=grid,
      in_specs=[
          pl.BlockSpec((1, S, D), lambda b, q: (b, 0, 0)),   # x: full seq per batch
          full_spec(wq.shape),
          full_spec(wkv.shape),
          full_spec(wo3.shape),
          full_spec(w13.shape),
          full_spec(w2.shape),
          full_spec(params['attn_norm_w'].shape),
          full_spec(params['ffn_norm_w'].shape),
      ],
      out_specs=pl.BlockSpec((1, tq, D), lambda b, q: (b, q, 0)),
      scratch_shapes=[
          pltpu.VMEM((n_kv_heads, S, head_dim), jnp.bfloat16),   # K (head-major)
          pltpu.VMEM((n_kv_heads, S, head_dim), jnp.bfloat16),   # V (head-major)
          pltpu.VMEM((n_heads, tq, head_dim), jnp.bfloat16),     # per-tile Q
      ],
      compiler_params=pltpu.CompilerParams(
          dimension_semantics=("parallel", "arbitrary"),
          vmem_limit_bytes=vmem_limit),
  )(x, wq, wkv, wo3, w13, w2, params['attn_norm_w'], params['ffn_norm_w'])


def _reference_block(x, params, *, n_heads, n_kv_heads, topk, eps=1e-6):
  """Pure-JAX replica of the PyTorch TransformerBlock forward (for checking)."""
  B, S, D = x.shape
  H = n_heads
  hd = D // H
  k_top = min(topk, S)

  def rms(v, w):
    vf = v.astype(jnp.float32)
    ms = jnp.mean(vf * vf, axis=-1, keepdims=True)
    return (vf * lax.rsqrt(ms + eps)).astype(v.dtype) * w.reshape(-1)

  xn = rms(x, params['attn_norm_w'])
  q = (xn @ params['wq_t']).reshape(B, S, H, hd).transpose(0, 2, 1, 3)
  k = (xn @ params['wk_t']).reshape(B, S, H, hd).transpose(0, 2, 1, 3)
  v = (xn @ params['wv_t']).reshape(B, S, H, hd).transpose(0, 2, 1, 3)
  sc = jnp.einsum('bhqd,bhkd->bhqk', q, k) / math.sqrt(hd)
  causal = jnp.where(jnp.arange(S)[None, :] <= jnp.arange(S)[:, None],
                     jnp.float32(0.0), -jnp.inf)
  sc = sc + causal
  vals, idx = lax.top_k(sc, k_top)
  bb = jnp.arange(B)[:, None, None, None]
  hh = jnp.arange(H)[None, :, None, None]
  qq = jnp.arange(S)[None, None, :, None]
  scattered = jnp.zeros_like(sc).at[bb, hh, qq, idx].set(vals)
  m = jnp.max(scattered, axis=-1, keepdims=True)
  e = jnp.exp(scattered - m)
  p = e / jnp.sum(e, axis=-1, keepdims=True)
  ctx = jnp.einsum('bhqk,bhkd->bhqd', p, v)
  ctx = ctx.transpose(0, 2, 1, 3).reshape(B, S, H * hd)
  h = x + ctx @ params['wo_t']
  hn = rms(h, params['ffn_norm_w'])
  a = hn @ params['w1_t']
  b = hn @ params['w3_t']
  return h + (jax.nn.silu(a) * b) @ params['w2_t']


if __name__ == "__main__":
  B, S = 2, 8
  dim, n_heads, n_kv_heads = 32, 4, 4
  hidden_dim = 64
  topk = 4                      # < S so the top-k sparsification is exercised
  head_dim = dim // n_heads

  key = jax.random.PRNGKey(0)
  keys = jax.random.split(key, 8)
  scale = 0.02
  params = {
      'wq_t': scale * jax.random.normal(keys[0], (dim, n_heads * head_dim), jnp.float32),
      'wk_t': scale * jax.random.normal(keys[1], (dim, n_kv_heads * head_dim), jnp.float32),
      'wv_t': scale * jax.random.normal(keys[2], (dim, n_kv_heads * head_dim), jnp.float32),
      'wo_t': scale * jax.random.normal(keys[3], (n_heads * head_dim, dim), jnp.float32),
      'w1_t': scale * jax.random.normal(keys[4], (dim, hidden_dim), jnp.float32),
      'w2_t': scale * jax.random.normal(keys[5], (hidden_dim, dim), jnp.float32),
      'w3_t': scale * jax.random.normal(keys[6], (dim, hidden_dim), jnp.float32),
      'attn_norm_w': jnp.ones((1, dim), jnp.float32),   # RMSNorm weight init = ones
      'ffn_norm_w': jnp.ones((1, dim), jnp.float32),
  }
  x = jax.random.normal(keys[7], (B, S, dim), jnp.float32)

  out = transformer_block(x, params, n_heads=n_heads, n_kv_heads=n_kv_heads,
                          topk=topk, eps=1e-6)
  jax.block_until_ready(out)
  assert out.shape == x.shape and out.dtype == x.dtype

  with jax.default_matmul_precision("highest"):
    ref = _reference_block(x, params, n_heads=n_heads, n_kv_heads=n_kv_heads,
                           topk=topk, eps=1e-6)
  err = float(jnp.max(jnp.abs(out - ref)))
  assert err < 2e-3, f"max abs error vs reference: {err}"

  print("KERNEL_OK")
</pallas_src>

<mosaic_0001>
module attributes {stable_mosaic.version = 11 : i64} {
  func.func @_transformer_block_kernel(%arg0: i32, %arg1: i32, %arg2: memref<1x8x32xf32, #tpu.memory_space<vmem>>, %arg3: memref<32x32xbf16, #tpu.memory_space<vmem>>, %arg4: memref<32x64xbf16, #tpu.memory_space<vmem>>, %arg5: memref<4x8x32xbf16, #tpu.memory_space<vmem>>, %arg6: memref<32x128xbf16, #tpu.memory_space<vmem>>, %arg7: memref<64x32xbf16, #tpu.memory_space<vmem>>, %arg8: memref<1x32xf32, #tpu.memory_space<vmem>>, %arg9: memref<1x32xf32, #tpu.memory_space<vmem>>, %arg10: memref<1x8x32xf32, #tpu.memory_space<vmem>>, %arg11: memref<4x8x8xbf16, #tpu.memory_space<vmem>>, %arg12: memref<4x8x8xbf16, #tpu.memory_space<vmem>>, %arg13: memref<4x8x8xbf16, #tpu.memory_space<vmem>>) attributes {dimension_semantics = [#tpu.dimension_semantics<parallel>, #tpu.dimension_semantics<arbitrary>], iteration_bounds = array<i64: 2, 1>, scalar_prefetch = 0 : i64, scratch_operands = 3 : i64, tpu.core_type = #tpu.core_type<tc>, window_params = [{transform_indices = @transform_0, window_bounds = array<i64: 1, 8, 32>}, {pipeline_mode = #tpu.pipeline_mode<synchronous>, transform_indices = @transform_1, window_bounds = array<i64: 32, 32>}, {pipeline_mode = #tpu.pipeline_mode<synchronous>, transform_indices = @transform_2, window_bounds = array<i64: 32, 64>}, {pipeline_mode = #tpu.pipeline_mode<synchronous>, transform_indices = @transform_3, window_bounds = array<i64: 4, 8, 32>}, {pipeline_mode = #tpu.pipeline_mode<synchronous>, transform_indices = @transform_4, window_bounds = array<i64: 32, 128>}, {pipeline_mode = #tpu.pipeline_mode<synchronous>, transform_indices = @transform_5, window_bounds = array<i64: 64, 32>}, {pipeline_mode = #tpu.pipeline_mode<synchronous>, transform_indices = @transform_6, window_bounds = array<i64: 1, 32>}, {pipeline_mode = #tpu.pipeline_mode<synchronous>, transform_indices = @transform_7, window_bounds = array<i64: 1, 32>}, {transform_indices = @transform_8, window_bounds = array<i64: 1, 8, 32>}]} {
    %c0_i32 = arith.constant 0 : i32
    %0 = arith.cmpi eq, %arg1, %c0_i32 : i32
    %1 = arith.extui %0 : i1 to i32
    %c0_i32_0 = arith.constant 0 : i32
    %2 = arith.cmpi ne, %1, %c0_i32_0 : i32
    scf.if %2 {
      %c0_78 = arith.constant 0 : index
      %c0_79 = arith.constant 0 : index
      %c0_80 = arith.constant 0 : index
      %171 = vector.load %arg2[%c0_78, %c0_79, %c0_80] : memref<1x8x32xf32, #tpu.memory_space<vmem>>, vector<1x8x32xf32>
      %172 = vector.shape_cast %171 : vector<1x8x32xf32> to vector<8x32xf32>
      %c0_81 = arith.constant 0 : index
      %c0_82 = arith.constant 0 : index
      %173 = vector.load %arg8[%c0_81, %c0_82] : memref<1x32xf32, #tpu.memory_space<vmem>>, vector<1x32xf32>
      %174 = arith.mulf %172, %172 : vector<8x32xf32>
      %cst_83 = arith.constant dense<0.000000e+00> : vector<8xf32>
      %175 = vector.multi_reduction <add>, %174, %cst_83 [1] : vector<8x32xf32> to vector<8xf32>
      %176 = vector.shape_cast %175 : vector<8xf32> to vector<8x1xf32>
      %cst_84 = arith.constant 3.200000e+01 : f32
      %177 = vector.broadcast %cst_84 : f32 to vector<8x1xf32>
      %178 = arith.divf %176, %177 : vector<8x1xf32>
      %cst_85 = arith.constant 9.99999997E-7 : f32
      %179 = vector.broadcast %cst_85 : f32 to vector<8x1xf32>
      %180 = arith.addf %178, %179 : vector<8x1xf32>
      %181 = math.rsqrt %180 : vector<8x1xf32>
      %182 = vector.broadcast %181 : vector<8x1xf32> to vector<8x32xf32>
      %183 = arith.mulf %172, %182 : vector<8x32xf32>
      %184 = vector.broadcast %173 : vector<1x32xf32> to vector<8x32xf32>
      %185 = arith.mulf %183, %184 : vector<8x32xf32>
      %186 = arith.truncf %185 : vector<8x32xf32> to vector<8x32xbf16>
      %c0_86 = arith.constant 0 : index
      %c0_87 = arith.constant 0 : index
      %187 = vector.load %arg4[%c0_86, %c0_87] : memref<32x64xbf16, #tpu.memory_space<vmem>>, vector<32x64xbf16>
      %cst_88 = arith.constant dense<0.000000e+00> : vector<8x64xf32>
      %188 = tpu.matmul %186, %187, %cst_88 {dimension_numbers = #tpu.dot_dimension_numbers<[1], [0], [0], [1], [0, 0, 1, 1], [], []>} : vector<8x32xbf16>, vector<32x64xbf16>, vector<8x64xf32> -> vector<8x64xf32>
      %189 = vector.extract_strided_slice %188 {offsets = [0, 0], sizes = [8, 8], strides = [1, 1]} : vector<8x64xf32> to vector<8x8xf32>
      %190 = arith.truncf %189 : vector<8x8xf32> to vector<8x8xbf16>
      %c0_89 = arith.constant 0 : index
      %c0_90 = arith.constant 0 : index
      %c0_91 = arith.constant 0 : index
      %191 = vector.load %arg11[%c0_89, %c0_90, %c0_91] : memref<4x8x8xbf16, #tpu.memory_space<vmem>>, vector<1x8x8xbf16>
      %192 = vector.shape_cast %191 : vector<1x8x8xbf16> to vector<8x8xbf16>
      %193 = vector.shape_cast %190 : vector<8x8xbf16> to vector<1x8x8xbf16>
      tpu.vector_store %arg11[%c0_89, %c0_90, %c0_91], %193 {strides = array<i32>} : memref<4x8x8xbf16, #tpu.memory_space<vmem>>, vector<1x8x8xbf16>,
      %194 = vector.extract_strided_slice %188 {offsets = [0, 32], sizes = [8, 8], strides = [1, 1]} : vector<8x64xf32> to vector<8x8xf32>
      %195 = arith.truncf %194 : vector<8x8xf32> to vector<8x8xbf16>
      %c0_92 = arith.constant 0 : index
      %c0_93 = arith.constant 0 : index
      %c0_94 = arith.constant 0 : index
      %196 = vector.load %arg12[%c0_92, %c0_93, %c0_94] : memref<4x8x8xbf16, #tpu.memory_space<vmem>>, vector<1x8x8xbf16>
      %197 = vector.shape_cast %196 : vector<1x8x8xbf16> to vector<8x8xbf16>
      %198 = vector.shape_cast %195 : vector<8x8xbf16> to vector<1x8x8xbf16>
      tpu.vector_store %arg12[%c0_92, %c0_93, %c0_94], %198 {strides = array<i32>} : memref<4x8x8xbf16, #tpu.memory_space<vmem>>, vector<1x8x8xbf16>,
      %199 = vector.extract_strided_slice %188 {offsets = [0, 8], sizes = [8, 8], strides = [1, 1]} : vector<8x64xf32> to vector<8x8xf32>
      %200 = arith.truncf %199 : vector<8x8xf32> to vector<8x8xbf16>
      %c1_95 = arith.constant 1 : index
      %c0_96 = arith.constant 0 : index
      %c0_97 = arith.constant 0 : index
      %201 = vector.load %arg11[%c1_95, %c0_96, %c0_97] : memref<4x8x8xbf16, #tpu.memory_space<vmem>>, vector<1x8x8xbf16>
      %202 = vector.shape_cast %201 : vector<1x8x8xbf16> to vector<8x8xbf16>
      %203 = vector.shape_cast %200 : vector<8x8xbf16> to vector<1x8x8xbf16>
      tpu.vector_store %arg11[%c1_95, %c0_96, %c0_97], %203 {strides = array<i32>} : memref<4x8x8xbf16, #tpu.memory_space<vmem>>, vector<1x8x8xbf16>,
      %204 = vector.extract_strided_slice %188 {offsets = [0, 40], sizes = [8, 8], strides = [1, 1]} : vector<8x64xf32> to vector<8x8xf32>
      %205 = arith.truncf %204 : vector<8x8xf32> to vector<8x8xbf16>
      %c1_98 = arith.constant 1 : index
      %c0_99 = arith.constant 0 : index
      %c0_100 = arith.constant 0 : index
      %206 = vector.load %arg12[%c1_98, %c0_99, %c0_100] : memref<4x8x8xbf16, #tpu.memory_space<vmem>>, vector<1x8x8xbf16>
      %207 = vector.shape_cast %206 : vector<1x8x8xbf16> to vector<8x8xbf16>
      %208 = vector.shape_cast %205 : vector<8x8xbf16> to vector<1x8x8xbf16>
      tpu.vector_store %arg12[%c1_98, %c0_99, %c0_100], %208 {strides = array<i32>} : memref<4x8x8xbf16, #tpu.memory_space<vmem>>, vector<1x8x8xbf16>,
      %209 = vector.extract_strided_slice %188 {offsets = [0, 16], sizes = [8, 8], strides = [1, 1]} : vector<8x64xf32> to vector<8x8xf32>
      %210 = arith.truncf %209 : vector<8x8xf32> to vector<8x8xbf16>
      %c2_101 = arith.constant 2 : index
      %c0_102 = arith.constant 0 : index
      %c0_103 = arith.constant 0 : index
      %211 = vector.load %arg11[%c2_101, %c0_102, %c0_103] : memref<4x8x8xbf16, #tpu.memory_space<vmem>>, vector<1x8x8xbf16>
      %212 = vector.shape_cast %211 : vector<1x8x8xbf16> to vector<8x8xbf16>
      %213 = vector.shape_cast %210 : vector<8x8xbf16> to vector<1x8x8xbf16>
      tpu.vector_store %arg11[%c2_101, %c0_102, %c0_103], %213 {strides = array<i32>} : memref<4x8x8xbf16, #tpu.memory_space<vmem>>, vector<1x8x8xbf16>,
      %214 = vector.extract_strided_slice %188 {offsets = [0, 48], sizes = [8, 8], strides = [1, 1]} : vector<8x64xf32> to vector<8x8xf32>
      %215 = arith.truncf %214 : vector<8x8xf32> to vector<8x8xbf16>
      %c2_104 = arith.constant 2 : index
      %c0_105 = arith.constant 0 : index
      %c0_106 = arith.constant 0 : index
      %216 = vector.load %arg12[%c2_104, %c0_105, %c0_106] : memref<4x8x8xbf16, #tpu.memory_space<vmem>>, vector<1x8x8xbf16>
      %217 = vector.shape_cast %216 : vector<1x8x8xbf16> to vector<8x8xbf16>
      %218 = vector.shape_cast %215 : vector<8x8xbf16> to vector<1x8x8xbf16>
      tpu.vector_store %arg12[%c2_104, %c0_105, %c0_106], %218 {strides = array<i32>} : memref<4x8x8xbf16, #tpu.memory_space<vmem>>, vector<1x8x8xbf16>,
      %219 = vector.extract_strided_slice %188 {offsets = [0, 24], sizes = [8, 8], strides = [1, 1]} : vector<8x64xf32> to vector<8x8xf32>
      %220 = arith.truncf %219 : vector<8x8xf32> to vector<8x8xbf16>
      %c3_107 = arith.constant 3 : index
      %c0_108 = arith.constant 0 : index
      %c0_109 = arith.constant 0 : index
      %221 = vector.load %arg11[%c3_107, %c0_108, %c0_109] : memref<4x8x8xbf16, #tpu.memory_space<vmem>>, vector<1x8x8xbf16>
      %222 = vector.shape_cast %221 : vector<1x8x8xbf16> to vector<8x8xbf16>
      %223 = vector.shape_cast %220 : vector<8x8xbf16> to vector<1x8x8xbf16>
      tpu.vector_store %arg11[%c3_107, %c0_108, %c0_109], %223 {strides = array<i32>} : memref<4x8x8xbf16, #tpu.memory_space<vmem>>, vector<1x8x8xbf16>,
      %224 = vector.extract_strided_slice %188 {offsets = [0, 56], sizes = [8, 8], strides = [1, 1]} : vector<8x64xf32> to vector<8x8xf32>
      %225 = arith.truncf %224 : vector<8x8xf32> to vector<8x8xbf16>
      %c3_110 = arith.constant 3 : index
      %c0_111 = arith.constant 0 : index
      %c0_112 = arith.constant 0 : index
      %226 = vector.load %arg12[%c3_110, %c0_111, %c0_112] : memref<4x8x8xbf16, #tpu.memory_space<vmem>>, vector<1x8x8xbf16>
      %227 = vector.shape_cast %226 : vector<1x8x8xbf16> to vector<8x8xbf16>
      %228 = vector.shape_cast %225 : vector<8x8xbf16> to vector<1x8x8xbf16>
      tpu.vector_store %arg12[%c3_110, %c0_111, %c0_112], %228 {strides = array<i32>} : memref<4x8x8xbf16, #tpu.memory_space<vmem>>, vector<1x8x8xbf16>,
    } else {
    }
    %c8_i32 = arith.constant 8 : i32
    %3 = arith.muli %arg1, %c8_i32 : i32
    %4 = tpu.assume_multiple %3, 8 : i32
    %c0 = arith.constant 0 : index
    %c0_1 = arith.constant 0 : index
    %c0_2 = arith.constant 0 : index
    %5 = vector.load %arg2[%c0, %c0_1, %c0_2] : memref<1x8x32xf32, #tpu.memory_space<vmem>>, vector<1x8x32xf32>
    %6 = vector.shape_cast %5 : vector<1x8x32xf32> to vector<8x32xf32>
    %c0_3 = arith.constant 0 : index
    %c0_4 = arith.constant 0 : index
    %7 = vector.load %arg8[%c0_3, %c0_4] : memref<1x32xf32, #tpu.memory_space<vmem>>, vector<1x32xf32>
    %8 = arith.mulf %6, %6 : vector<8x32xf32>
    %cst = arith.constant dense<0.000000e+00> : vector<8xf32>
    %9 = vector.multi_reduction <add>, %8, %cst [1] : vector<8x32xf32> to vector<8xf32>
    %10 = vector.shape_cast %9 : vector<8xf32> to vector<8x1xf32>
    %cst_5 = arith.constant 3.200000e+01 : f32
    %11 = vector.broadcast %cst_5 : f32 to vector<8x1xf32>
    %12 = arith.divf %10, %11 : vector<8x1xf32>
    %cst_6 = arith.constant 9.99999997E-7 : f32
    %13 = vector.broadcast %cst_6 : f32 to vector<8x1xf32>
    %14 = arith.addf %12, %13 : vector<8x1xf32>
    %15 = math.rsqrt %14 : vector<8x1xf32>
    %16 = vector.broadcast %15 : vector<8x1xf32> to vector<8x32xf32>
    %17 = arith.mulf %6, %16 : vector<8x32xf32>
    %18 = vector.broadcast %7 : vector<1x32xf32> to vector<8x32xf32>
    %19 = arith.mulf %17, %18 : vector<8x32xf32>
    %20 = arith.truncf %19 : vector<8x32xf32> to vector<8x32xbf16>
    %c0_7 = arith.constant 0 : index
    %c0_8 = arith.constant 0 : index
    %21 = vector.load %arg3[%c0_7, %c0_8] : memref<32x32xbf16, #tpu.memory_space<vmem>>, vector<32x32xbf16>
    %cst_9 = arith.constant dense<0.000000e+00> : vector<8x32xf32>
    %22 = tpu.matmul %20, %21, %cst_9 {dimension_numbers = #tpu.dot_dimension_numbers<[1], [0], [0], [1], [0, 0, 1, 1], [], []>} : vector<8x32xbf16>, vector<32x32xbf16>, vector<8x32xf32> -> vector<8x32xf32>
    %23 = vector.extract_strided_slice %22 {offsets = [0, 0], sizes = [8, 8], strides = [1, 1]} : vector<8x32xf32> to vector<8x8xf32>
    %24 = arith.truncf %23 : vector<8x8xf32> to vector<8x8xbf16>
    %c0_10 = arith.constant 0 : index
    %c0_11 = arith.constant 0 : index
    %c0_12 = arith.constant 0 : index
    %25 = vector.load %arg13[%c0_10, %c0_11, %c0_12] : memref<4x8x8xbf16, #tpu.memory_space<vmem>>, vector<1x8x8xbf16>
    %26 = vector.shape_cast %25 : vector<1x8x8xbf16> to vector<8x8xbf16>
    %27 = vector.shape_cast %24 : vector<8x8xbf16> to vector<1x8x8xbf16>
    tpu.vector_store %arg13[%c0_10, %c0_11, %c0_12], %27 {strides = array<i32>} : memref<4x8x8xbf16, #tpu.memory_space<vmem>>, vector<1x8x8xbf16>,
    %28 = vector.extract_strided_slice %22 {offsets = [0, 8], sizes = [8, 8], strides = [1, 1]} : vector<8x32xf32> to vector<8x8xf32>
    %29 = arith.truncf %28 : vector<8x8xf32> to vector<8x8xbf16>
    %c1 = arith.constant 1 : index
    %c0_13 = arith.constant 0 : index
    %c0_14 = arith.constant 0 : index
    %30 = vector.load %arg13[%c1, %c0_13, %c0_14] : memref<4x8x8xbf16, #tpu.memory_space<vmem>>, vector<1x8x8xbf16>
    %31 = vector.shape_cast %30 : vector<1x8x8xbf16> to vector<8x8xbf16>
    %32 = vector.shape_cast %29 : vector<8x8xbf16> to vector<1x8x8xbf16>
    tpu.vector_store %arg13[%c1, %c0_13, %c0_14], %32 {strides = array<i32>} : memref<4x8x8xbf16, #tpu.memory_space<vmem>>, vector<1x8x8xbf16>,
    %33 = vector.extract_strided_slice %22 {offsets = [0, 16], sizes = [8, 8], strides = [1, 1]} : vector<8x32xf32> to vector<8x8xf32>
    %34 = arith.truncf %33 : vector<8x8xf32> to vector<8x8xbf16>
    %c2 = arith.constant 2 : index
    %c0_15 = arith.constant 0 : index
    %c0_16 = arith.constant 0 : index
    %35 = vector.load %arg13[%c2, %c0_15, %c0_16] : memref<4x8x8xbf16, #tpu.memory_space<vmem>>, vector<1x8x8xbf16>
    %36 = vector.shape_cast %35 : vector<1x8x8xbf16> to vector<8x8xbf16>
    %37 = vector.shape_cast %34 : vector<8x8xbf16> to vector<1x8x8xbf16>
    tpu.vector_store %arg13[%c2, %c0_15, %c0_16], %37 {strides = array<i32>} : memref<4x8x8xbf16, #tpu.memory_space<vmem>>, vector<1x8x8xbf16>,
    %38 = vector.extract_strided_slice %22 {offsets = [0, 24], sizes = [8, 8], strides = [1, 1]} : vector<8x32xf32> to vector<8x8xf32>
    %39 = arith.truncf %38 : vector<8x8xf32> to vector<8x8xbf16>
    %c3 = arith.constant 3 : index
    %c0_17 = arith.constant 0 : index
    %c0_18 = arith.constant 0 : index
    %40 = vector.load %arg13[%c3, %c0_17, %c0_18] : memref<4x8x8xbf16, #tpu.memory_space<vmem>>, vector<1x8x8xbf16>
    %41 = vector.shape_cast %40 : vector<1x8x8xbf16> to vector<8x8xbf16>
    %42 = vector.shape_cast %39 : vector<8x8xbf16> to vector<1x8x8xbf16>
    tpu.vector_store %arg13[%c3, %c0_17, %c0_18], %42 {strides = array<i32>} : memref<4x8x8xbf16, #tpu.memory_space<vmem>>, vector<1x8x8xbf16>,
    %43 = tpu.iota {dimensions = array<i32: 1>} : vector<1x8x8xi32>
    %44 = vector.broadcast %4 : i32 to vector<1x8x8xi32>
    %45 = arith.addi %43, %44 : vector<1x8x8xi32>
    %46 = tpu.iota {dimensions = array<i32: 2>} : vector<1x8x8xi32>
    %47 = arith.cmpi sle, %46, %45 : vector<1x8x8xi32>
    %48 = arith.sitofp %46 : vector<1x8x8xi32> to vector<1x8x8xf32>
    %cst_19 = arith.constant 1.000000e+24 : f32
    %49 = vector.broadcast %cst_19 : f32 to vector<1x8x8xf32>
    %50 = arith.mulf %48, %49 : vector<1x8x8xf32>
    %cst_20 = arith.constant -1.000000e+30 : f32
    %51 = vector.broadcast %cst_20 : f32 to vector<1x8x8xf32>
    %52 = arith.subf %51, %50 : vector<1x8x8xf32>
    %cst_21 = arith.constant 0.000000e+00 : f32
    %53 = vector.broadcast %cst_21 : f32 to vector<8x32xf32>
    %c0_22 = arith.constant 0 : index
    %c0_23 = arith.constant 0 : index
    %c0_24 = arith.constant 0 : index
    %54 = vector.load %arg13[%c0_22, %c0_23, %c0_24] : memref<4x8x8xbf16, #tpu.memory_space<vmem>>, vector<4x8x8xbf16>
    %c0_25 = arith.constant 0 : index
    %c0_26 = arith.constant 0 : index
    %c0_27 = arith.constant 0 : index
    %55 = vector.load %arg11[%c0_25, %c0_26, %c0_27] : memref<4x8x8xbf16, #tpu.memory_space<vmem>>, vector<4x8x8xbf16>
    %c0_28 = arith.constant 0 : index
    %c0_29 = arith.constant 0 : index
    %c0_30 = arith.constant 0 : index
    %56 = vector.load %arg12[%c0_28, %c0_29, %c0_30] : memref<4x8x8xbf16, #tpu.memory_space<vmem>>, vector<4x8x8xbf16>
    "tpu.trace_start"() <{level = 10 : i32, message = "hqd,hkd->hqk"}> : () -> ()
    %cst_31 = arith.constant dense<0.000000e+00> : vector<4x8x8xf32>
    %57 = tpu.matmul %54, %55, %cst_31 {dimension_numbers = #tpu.dot_dimension_numbers<[2], [2], [1], [1], [0, 0, 0, 1, 1, 1], [0], [0]>} : vector<4x8x8xbf16>, vector<4x8x8xbf16>, vector<4x8x8xf32> -> vector<4x8x8xf32>
    "tpu.trace_stop"() : () -> ()
    %cst_32 = arith.constant 0.353553385 : f32
    %58 = vector.broadcast %cst_32 : f32 to vector<4x8x8xf32>
    %59 = arith.mulf %57, %58 : vector<4x8x8xf32>
    %cst_33 = arith.constant 0xFF800000 : f32
    %60 = vector.shape_cast %47 : vector<1x8x8xi1> to vector<1x8x8xi1>
    %61 = vector.broadcast %60 : vector<1x8x8xi1> to vector<4x8x8xi1>
    %62 = vector.broadcast %cst_33 : f32 to vector<4x8x8xf32>
    %63 = arith.select %61, %59, %62 : vector<4x8x8xi1>, vector<4x8x8xf32>
    %64 = vector.shape_cast %47 : vector<1x8x8xi1> to vector<1x8x8xi1>
    %65 = vector.broadcast %64 : vector<1x8x8xi1> to vector<4x8x8xi1>
    %66 = vector.shape_cast %52 : vector<1x8x8xf32> to vector<1x8x8xf32>
    %67 = vector.broadcast %66 : vector<1x8x8xf32> to vector<4x8x8xf32>
    %68 = arith.select %65, %63, %67 : vector<4x8x8xi1>, vector<4x8x8xf32>
    %cst_34 = arith.constant 0.000000e+00 : f32
    %69 = vector.broadcast %cst_34 : f32 to vector<4x8x8xf32>
    %cst_35 = arith.constant dense<0xFF800000> : vector<4x8xf32>
    %70 = vector.multi_reduction <maximumf>, %68, %cst_35 [2] : vector<4x8x8xf32> to vector<4x8xf32>
    %71 = vector.shape_cast %70 : vector<4x8xf32> to vector<4x8x1xf32>
    %72 = vector.broadcast %71 : vector<4x8x1xf32> to vector<4x8x8xf32>
    %73 = arith.cmpf oeq, %68, %72 : vector<4x8x8xf32>
    %74 = arith.select %73, %63, %69 : vector<4x8x8xi1>, vector<4x8x8xf32>
    %cst_36 = arith.constant 0xFF800000 : f32
    %75 = vector.broadcast %cst_36 : f32 to vector<4x8x8xf32>
    %76 = arith.select %73, %75, %68 : vector<4x8x8xi1>, vector<4x8x8xf32>
    %cst_37 = arith.constant dense<0xFF800000> : vector<4x8xf32>
    %77 = vector.multi_reduction <maximumf>, %76, %cst_37 [2] : vector<4x8x8xf32> to vector<4x8xf32>
    %78 = vector.shape_cast %77 : vector<4x8xf32> to vector<4x8x1xf32>
    %79 = vector.broadcast %78 : vector<4x8x1xf32> to vector<4x8x8xf32>
    %80 = arith.cmpf oeq, %76, %79 : vector<4x8x8xf32>
    %81 = arith.select %80, %63, %74 : vector<4x8x8xi1>, vector<4x8x8xf32>
    %cst_38 = arith.constant 0xFF800000 : f32
    %82 = vector.broadcast %cst_38 : f32 to vector<4x8x8xf32>
    %83 = arith.select %80, %82, %76 : vector<4x8x8xi1>, vector<4x8x8xf32>
    %cst_39 = arith.constant dense<0xFF800000> : vector<4x8xf32>
    %84 = vector.multi_reduction <maximumf>, %83, %cst_39 [2] : vector<4x8x8xf32> to vector<4x8xf32>
    %85 = vector.shape_cast %84 : vector<4x8xf32> to vector<4x8x1xf32>
    %86 = vector.broadcast %85 : vector<4x8x1xf32> to vector<4x8x8xf32>
    %87 = arith.cmpf oeq, %83, %86 : vector<4x8x8xf32>
    %88 = arith.select %87, %63, %81 : vector<4x8x8xi1>, vector<4x8x8xf32>
    %cst_40 = arith.constant 0xFF800000 : f32
    %89 = vector.broadcast %cst_40 : f32 to vector<4x8x8xf32>
    %90 = arith.select %87, %89, %83 : vector<4x8x8xi1>, vector<4x8x8xf32>
    %cst_41 = arith.constant dense<0xFF800000> : vector<4x8xf32>
    %91 = vector.multi_reduction <maximumf>, %90, %cst_41 [2] : vector<4x8x8xf32> to vector<4x8xf32>
    %92 = vector.shape_cast %91 : vector<4x8xf32> to vector<4x8x1xf32>
    %93 = vector.broadcast %92 : vector<4x8x1xf32> to vector<4x8x8xf32>
    %94 = arith.cmpf oeq, %90, %93 : vector<4x8x8xf32>
    %95 = arith.select %94, %63, %88 : vector<4x8x8xi1>, vector<4x8x8xf32>
    %cst_42 = arith.constant 0.000000e+00 : f32
    %96 = vector.broadcast %cst_42 : f32 to vector<4x8x1xf32>
    %97 = arith.maximumf %71, %96 : vector<4x8x1xf32>
    %98 = vector.broadcast %97 : vector<4x8x1xf32> to vector<4x8x8xf32>
    %99 = arith.subf %95, %98 : vector<4x8x8xf32>
    %100 = math.exp %99 : vector<4x8x8xf32>
    %cst_43 = arith.constant dense<0.000000e+00> : vector<4x8xf32>
    %101 = vector.multi_reduction <add>, %100, %cst_43 [2] : vector<4x8x8xf32> to vector<4x8xf32>
    %102 = vector.shape_cast %101 : vector<4x8xf32> to vector<4x8x1xf32>
    %103 = tpu.reciprocal %102 {approx = true} : vector<4x8x1xf32> -> vector<4x8x1xf32>
    %104 = vector.broadcast %103 : vector<4x8x1xf32> to vector<4x8x8xf32>
    %105 = arith.mulf %100, %104 : vector<4x8x8xf32>
    %106 = arith.truncf %105 : vector<4x8x8xf32> to vector<4x8x8xbf16>
    "tpu.trace_start"() <{level = 10 : i32, message = "hqk,hkd->hqd"}> : () -> ()
    %cst_44 = arith.constant dense<0.000000e+00> : vector<4x8x8xf32>
    %107 = tpu.matmul %106, %56, %cst_44 {dimension_numbers = #tpu.dot_dimension_numbers<[2], [1], [1], [2], [0, 0, 0, 1, 1, 2], [0], [0]>} : vector<4x8x8xbf16>, vector<4x8x8xbf16>, vector<4x8x8xf32> -> vector<4x8x8xf32>
    "tpu.trace_stop"() : () -> ()
    %108 = vector.extract_strided_slice %107 {offsets = [0, 0, 0], sizes = [1, 8, 8], strides = [1, 1, 1]} : vector<4x8x8xf32> to vector<1x8x8xf32>
    %109 = vector.shape_cast %108 : vector<1x8x8xf32> to vector<8x8xf32>
    %110 = arith.truncf %109 : vector<8x8xf32> to vector<8x8xbf16>
    %c0_45 = arith.constant 0 : index
    %c0_46 = arith.constant 0 : index
    %c0_47 = arith.constant 0 : index
    %111 = vector.load %arg5[%c0_45, %c0_46, %c0_47] : memref<4x8x32xbf16, #tpu.memory_space<vmem>>, vector<1x8x32xbf16>
    %112 = vector.shape_cast %111 : vector<1x8x32xbf16> to vector<8x32xbf16>
    %cst_48 = arith.constant dense<0.000000e+00> : vector<8x32xf32>
    %113 = tpu.matmul %110, %112, %cst_48 {dimension_numbers = #tpu.dot_dimension_numbers<[1], [0], [0], [1], [0, 0, 1, 1], [], []>} : vector<8x8xbf16>, vector<8x32xbf16>, vector<8x32xf32> -> vector<8x32xf32>
    %114 = arith.addf %53, %113 : vector<8x32xf32>
    %115 = vector.extract_strided_slice %107 {offsets = [1, 0, 0], sizes = [1, 8, 8], strides = [1, 1, 1]} : vector<4x8x8xf32> to vector<1x8x8xf32>
    %116 = vector.shape_cast %115 : vector<1x8x8xf32> to vector<8x8xf32>
    %117 = arith.truncf %116 : vector<8x8xf32> to vector<8x8xbf16>
    %c1_49 = arith.constant 1 : index
    %c0_50 = arith.constant 0 : index
    %c0_51 = arith.constant 0 : index
    %118 = vector.load %arg5[%c1_49, %c0_50, %c0_51] : memref<4x8x32xbf16, #tpu.memory_space<vmem>>, vector<1x8x32xbf16>
    %119 = vector.shape_cast %118 : vector<1x8x32xbf16> to vector<8x32xbf16>
    %cst_52 = arith.constant dense<0.000000e+00> : vector<8x32xf32>
    %120 = tpu.matmul %117, %119, %cst_52 {dimension_numbers = #tpu.dot_dimension_numbers<[1], [0], [0], [1], [0, 0, 1, 1], [], []>} : vector<8x8xbf16>, vector<8x32xbf16>, vector<8x32xf32> -> vector<8x32xf32>
    %121 = arith.addf %114, %120 : vector<8x32xf32>
    %122 = vector.extract_strided_slice %107 {offsets = [2, 0, 0], sizes = [1, 8, 8], strides = [1, 1, 1]} : vector<4x8x8xf32> to vector<1x8x8xf32>
    %123 = vector.shape_cast %122 : vector<1x8x8xf32> to vector<8x8xf32>
    %124 = arith.truncf %123 : vector<8x8xf32> to vector<8x8xbf16>
    %c2_53 = arith.constant 2 : index
    %c0_54 = arith.constant 0 : index
    %c0_55 = arith.constant 0 : index
    %125 = vector.load %arg5[%c2_53, %c0_54, %c0_55] : memref<4x8x32xbf16, #tpu.memory_space<vmem>>, vector<1x8x32xbf16>
    %126 = vector.shape_cast %125 : vector<1x8x32xbf16> to vector<8x32xbf16>
    %cst_56 = arith.constant dense<0.000000e+00> : vector<8x32xf32>
    %127 = tpu.matmul %124, %126, %cst_56 {dimension_numbers = #tpu.dot_dimension_numbers<[1], [0], [0], [1], [0, 0, 1, 1], [], []>} : vector<8x8xbf16>, vector<8x32xbf16>, vector<8x32xf32> -> vector<8x32xf32>
    %128 = arith.addf %121, %127 : vector<8x32xf32>
    %129 = vector.extract_strided_slice %107 {offsets = [3, 0, 0], sizes = [1, 8, 8], strides = [1, 1, 1]} : vector<4x8x8xf32> to vector<1x8x8xf32>
    %130 = vector.shape_cast %129 : vector<1x8x8xf32> to vector<8x8xf32>
    %131 = arith.truncf %130 : vector<8x8xf32> to vector<8x8xbf16>
    %c3_57 = arith.constant 3 : index
    %c0_58 = arith.constant 0 : index
    %c0_59 = arith.constant 0 : index
    %132 = vector.load %arg5[%c3_57, %c0_58, %c0_59] : memref<4x8x32xbf16, #tpu.memory_space<vmem>>, vector<1x8x32xbf16>
    %133 = vector.shape_cast %132 : vector<1x8x32xbf16> to vector<8x32xbf16>
    %cst_60 = arith.constant dense<0.000000e+00> : vector<8x32xf32>
    %134 = tpu.matmul %131, %133, %cst_60 {dimension_numbers = #tpu.dot_dimension_numbers<[1], [0], [0], [1], [0, 0, 1, 1], [], []>} : vector<8x8xbf16>, vector<8x32xbf16>, vector<8x32xf32> -> vector<8x32xf32>
    %135 = arith.addf %128, %134 : vector<8x32xf32>
    %136 = arith.addf %6, %135 : vector<8x32xf32>
    %c0_61 = arith.constant 0 : index
    %c0_62 = arith.constant 0 : index
    %137 = vector.load %arg9[%c0_61, %c0_62] : memref<1x32xf32, #tpu.memory_space<vmem>>, vector<1x32xf32>
    %138 = arith.mulf %136, %136 : vector<8x32xf32>
    %cst_63 = arith.constant dense<0.000000e+00> : vector<8xf32>
    %139 = vector.multi_reduction <add>, %138, %cst_63 [1] : vector<8x32xf32> to vector<8xf32>
    %140 = vector.shape_cast %139 : vector<8xf32> to vector<8x1xf32>
    %cst_64 = arith.constant 3.200000e+01 : f32
    %141 = vector.broadcast %cst_64 : f32 to vector<8x1xf32>
    %142 = arith.divf %140, %141 : vector<8x1xf32>
    %cst_65 = arith.constant 9.99999997E-7 : f32
    %143 = vector.broadcast %cst_65 : f32 to vector<8x1xf32>
    %144 = arith.addf %142, %143 : vector<8x1xf32>
    %145 = math.rsqrt %144 : vector<8x1xf32>
    %146 = vector.broadcast %145 : vector<8x1xf32> to vector<8x32xf32>
    %147 = arith.mulf %136, %146 : vector<8x32xf32>
    %148 = vector.broadcast %137 : vector<1x32xf32> to vector<8x32xf32>
    %149 = arith.mulf %147, %148 : vector<8x32xf32>
    %150 = arith.truncf %149 : vector<8x32xf32> to vector<8x32xbf16>
    %c0_66 = arith.constant 0 : index
    %c0_67 = arith.constant 0 : index
    %151 = vector.load %arg6[%c0_66, %c0_67] : memref<32x128xbf16, #tpu.memory_space<vmem>>, vector<32x128xbf16>
    %cst_68 = arith.constant dense<0.000000e+00> : vector<8x128xf32>
    %152 = tpu.matmul %150, %151, %cst_68 {dimension_numbers = #tpu.dot_dimension_numbers<[1], [0], [0], [1], [0, 0, 1, 1], [], []>} : vector<8x32xbf16>, vector<32x128xbf16>, vector<8x128xf32> -> vector<8x128xf32>
    %153 = vector.extract_strided_slice %152 {offsets = [0, 0], sizes = [8, 64], strides = [1, 1]} : vector<8x128xf32> to vector<8x64xf32>
    %154 = vector.extract_strided_slice %152 {offsets = [0, 64], sizes = [8, 64], strides = [1, 1]} : vector<8x128xf32> to vector<8x64xf32>
    %cst_69 = arith.constant 0.000000e+00 : f32
    %155 = vector.broadcast %cst_69 : f32 to vector<8x64xf32>
    %156 = arith.subf %155, %153 : vector<8x64xf32>
    %157 = math.exp %156 : vector<8x64xf32>
    %cst_70 = arith.constant 1.000000e+00 : f32
    %158 = vector.broadcast %cst_70 : f32 to vector<8x64xf32>
    %159 = arith.addf %158, %157 : vector<8x64xf32>
    %cst_71 = arith.constant 1.000000e+00 : f32
    %160 = vector.broadcast %cst_71 : f32 to vector<8x64xf32>
    %161 = arith.divf %160, %159 : vector<8x64xf32>
    %162 = arith.mulf %153, %161 : vector<8x64xf32>
    %163 = arith.mulf %162, %154 : vector<8x64xf32>
    %164 = arith.truncf %163 : vector<8x64xf32> to vector<8x64xbf16>
    %c0_72 = arith.constant 0 : index
    %c0_73 = arith.constant 0 : index
    %165 = vector.load %arg7[%c0_72, %c0_73] : memref<64x32xbf16, #tpu.memory_space<vmem>>, vector<64x32xbf16>
    %cst_74 = arith.constant dense<0.000000e+00> : vector<8x32xf32>
    %166 = tpu.matmul %164, %165, %cst_74 {dimension_numbers = #tpu.dot_dimension_numbers<[1], [0], [0], [1], [0, 0, 1, 1], [], []>} : vector<8x64xbf16>, vector<64x32xbf16>, vector<8x32xf32> -> vector<8x32xf32>
    %167 = arith.addf %136, %166 : vector<8x32xf32>
    %c0_75 = arith.constant 0 : index
    %c0_76 = arith.constant 0 : index
    %c0_77 = arith.constant 0 : index
    %168 = vector.load %arg10[%c0_75, %c0_76, %c0_77] : memref<1x8x32xf32, #tpu.memory_space<vmem>>, vector<1x8x32xf32>
    %169 = vector.shape_cast %168 : vector<1x8x32xf32> to vector<8x32xf32>
    %170 = vector.shape_cast %167 : vector<8x32xf32> to vector<1x8x32xf32>
    tpu.vector_store %arg10[%c0_75, %c0_76, %c0_77], %170 {strides = array<i32>} : memref<1x8x32xf32, #tpu.memory_space<vmem>>, vector<1x8x32xf32>,
    return
  }
  func.func @transform_0(%arg0: i32, %arg1: i32) -> (i32, i32, i32) {
    %c0_i32 = arith.constant 0 : i32
    %c0_i32_0 = arith.constant 0 : i32
    %c0_i32_1 = arith.constant 0 : i32
    return %arg0, %c0_i32, %c0_i32_0 : i32, i32, i32
  }
  func.func @transform_1(%arg0: i32, %arg1: i32) -> (i32, i32) {
    %c0_i32 = arith.constant 0 : i32
    %c0_i32_0 = arith.constant 0 : i32
    %c0_i32_1 = arith.constant 0 : i32
    return %c0_i32, %c0_i32_0 : i32, i32
  }
  func.func @transform_2(%arg0: i32, %arg1: i32) -> (i32, i32) {
    %c0_i32 = arith.constant 0 : i32
    %c0_i32_0 = arith.constant 0 : i32
    %c0_i32_1 = arith.constant 0 : i32
    return %c0_i32, %c0_i32_0 : i32, i32
  }
  func.func @transform_3(%arg0: i32, %arg1: i32) -> (i32, i32, i32) {
    %c0_i32 = arith.constant 0 : i32
    %c0_i32_0 = arith.constant 0 : i32
    %c0_i32_1 = arith.constant 0 : i32
    %c0_i32_2 = arith.constant 0 : i32
    return %c0_i32, %c0_i32_0, %c0_i32_1 : i32, i32, i32
  }
  func.func @transform_4(%arg0: i32, %arg1: i32) -> (i32, i32) {
    %c0_i32 = arith.constant 0 : i32
    %c0_i32_0 = arith.constant 0 : i32
    %c0_i32_1 = arith.constant 0 : i32
    return %c0_i32, %c0_i32_0 : i32, i32
  }
  func.func @transform_5(%arg0: i32, %arg1: i32) -> (i32, i32) {
    %c0_i32 = arith.constant 0 : i32
    %c0_i32_0 = arith.constant 0 : i32
    %c0_i32_1 = arith.constant 0 : i32
    return %c0_i32, %c0_i32_0 : i32, i32
  }
  func.func @transform_6(%arg0: i32, %arg1: i32) -> (i32, i32) {
    %c0_i32 = arith.constant 0 : i32
    %c0_i32_0 = arith.constant 0 : i32
    %c0_i32_1 = arith.constant 0 : i32
    return %c0_i32, %c0_i32_0 : i32, i32
  }
  func.func @transform_7(%arg0: i32, %arg1: i32) -> (i32, i32) {
    %c0_i32 = arith.constant 0 : i32
    %c0_i32_0 = arith.constant 0 : i32
    %c0_i32_1 = arith.constant 0 : i32
    return %c0_i32, %c0_i32_0 : i32, i32
  }
  func.func @transform_8(%arg0: i32, %arg1: i32) -> (i32, i32, i32) {
    %c0_i32 = arith.constant 0 : i32
    %c0_i32_0 = arith.constant 0 : i32
    return %arg0, %arg1, %c0_i32 : i32, i32, i32
  }
}

</mosaic_0001>

<bundles_post_ra>
// kernel: tpu_custom_call.1
= control target key start
LH: loop header
LB: loop body
LE: loop exit
PB: predicated region body
PF: predicated region fallthrough
CT: control target
= control target key end

     0   :  { %13 = vsyncpa [#allocation6], 0  ;;  %s2472_s0 = inlined_call_operand.vmem [shape: f32[2,8,32], index: 0, kind: input, shape index: {}]   ;;  %s2473_s1 = inlined_call_operand.vmem [shape: bf16[32,32], index: 1, kind: input, shape index: {}]   ;;  %s2474_s2 = inlined_call_operand.vmem [shape: bf16[32,64], index: 2, kind: input, shape index: {}]   ;;  %s2475_s3 = inlined_call_operand.hbm [shape: bf16[4,8,32], index: 3, kind: input, shape index: {}]   ;;  %s2476_s4 = inlined_call_operand.hbm [shape: bf16[32,128], index: 4, kind: input, shape index: {}]   ;;  %s2477_s5 = inlined_call_operand.vmem [shape: bf16[64,32], index: 5, kind: input, shape index: {}]   ;;  %s2478_s6 = inlined_call_operand.vmem [shape: f32[1,32], index: 6, kind: input, shape index: {}]   ;;  %s2479_s7 = inlined_call_operand.vmem [shape: f32[1,32], index: 7, kind: input, shape index: {}]   ;;  %s2480_s8 = inlined_call_operand.hbm [shape: f32[2,8,32], index: 8, kind: output, shape index: {}]  }
   0x1   :  { %14 = vsyncpa [#allocation9], 0 }
   0x2   :  { %15 = vsyncpa [#allocation7], 0 }
   0x3   :  { %17 = vsyncpa [#allocation7 + $0x1], 0  ;;  %s2094_s27 = smov 0   ;;  %s2096_s28 = smov 0  }
   0x4   :  { %s2098_s29 = smov 0   ;;  %s2100_s30 = smov 0  }
   0x5   :  { %s2102_s9 = smov 0   ;;  %s2104_s10 = smov 0  }
   0x6 LB: > { %s1578_s11 = sadd.s32 4294967295, %s2032_s10   ;;  %s1579_s12 = sadd.s32 4294967294, %s2032_s10   ;;  %s2032_s10 = sphi %s2104_s10, %s23_s10   ;;  %s2028_s9 = sphi %s2102_s9, %s2495_s9   ;;  %s2024_s30 = sphi %s2100_s30, %s2494_s30   ;;  %s2020_s29 = sphi %s2098_s29, %s2493_s29   ;;  %s2016_s28 = sphi %s2096_s28, %s2492_s28   ;;  %s2012_s27 = sphi %s2094_s27, %s2491_s27  }
   0x7   : > { %s35_s13 = sadd.s32 1, %s2028_s9  ;;  %s217_s14 = sadd.s32 1, %s2020_s29 }
   0x8   : > { %p37_p0 = scmp.ge.s32.totalorder %s35_s13, 2  ;;  %p227_p1 = scmp.ne.s32.totalorder %s2020_s29, %s2016_s28 }
   0x9   : > { %p228_p2 = scmp.eq.s32.totalorder %s1578_s11, 1  ;;  %p233_p3 = scmp.ne.s32.totalorder %s2016_s28, %s2012_s27 }
   0xa   : > { %s2497_s13 = smov (%p37_p0, %s35_s13), 0  ;;  %p234_p5 = scmp.eq.s32.totalorder %s1579_s12, 1 }
   0xb   : > { %p2134_p4 = por %p228_p2, %p227_p1  ;;  %s212_s16 = ssub.s32 %s2028_s9, %s2497_s13 }
   0xc   : > { %p1580_p6 = scmp.ge.s32.totalorder %s2032_s10, 1  ;;  %p215_p7 = scmp.eq.s32.totalorder %s212_s16, 0 }
   0xd   : > { %s2482_s15 = scalar_select %p2134_p4, 1, 0 }
   0xe   : > { %p2141_p8 = por %p234_p5, %p233_p3  ;;  %p241_p9 = scmp.lt.s32.totalorder %s2032_s10, 3 }
   0xf   : > { %s2147_s18 = scalar_select %p215_p7, %s2020_s29, %s217_s14  }
  0x10   : > { %s2483_s17 = scalar_select %p2141_p8, 1, 0 }
  0x11   : > { %p2149_p10 = pnand %p1580_p6, %p241_p9  ;;  %p2153_p11 = scmp.eq.s32.totalorder %s1578_s11, 0 }
  0x12   : > { %s2034_s21 = smov [#allocation5]   ;;  %s2035_s24 = smov [#allocation8]  }
  0x13   : > { %p1782_p12 = pneg %p2149_p10  ;;  %s259_s22 = sshll.u32 %s2034_s21, 4  ;;  %s260_s22 = int_to_ptr.vmem [resolvable:$true] %s259_s22 }
  0x14   : > { %s272_s25 = sshll.u32 %s2035_s24, 4  ;;  %s1907_s26 = scalar_lea.vmem %s260_s22, 256  ;;  %s273_s25 = int_to_ptr.vmem [resolvable:$true] %s272_s25 }
  0x15   : > { %p2161_p13 = pnand %p2153_p11, %p1782_p12  ;;  %p1908_p1 = scmp.ne.s32.totalorder %s260_s22, %s1907_s26 }
  0x16   : > { %p1915_p5 = scmp.lt.s32.totalorder %s260_s22, %s260_s22  ;;  %p1916_p6 = scmp.lt.s32.totalorder %s1907_s26, %s1907_s26 }
  0x17   : > { %p1898_p0 = pneg %p2161_p13 }
  0x18   : > { %p1917_p7 = por %p1916_p6, %p1915_p5 }
  0x19   : > { %p1910_p2 = pnand %p1908_p1, %p1898_p0 }
  0x1b   : > { %p1911_p3 = pneg %p1910_p2 }
  0x1d   : > { %p1918_p9 = pnand %p1917_p7, %p1911_p3 }
  0x1f   : > { %1921 = shalt.err (!%p1918_p9)
}
  0x20   : > { %s2036_s11 = smov 64   ;;  %s2037_s12 = smov 4  }
  0x21   : > { %1785 = dma.hbm_to_vmem [thread:$0]  (!%p2161_p13), %s2475_s3, 256, %s260_s22, [#allocation6], %s2036_s11, %s2036_s11, %s2037_s12  }
  0x22   : > { %s1933_s21 = scalar_lea.vmem %s273_s25, 256  ;;  %p1941_p8 = scmp.lt.s32.totalorder %s273_s25, %s273_s25 }
  0x23   : > { %p1934_p12 = scmp.ne.s32.totalorder %s273_s25, %s1933_s21  ;;  %p1942_p4 = scmp.lt.s32.totalorder %s1933_s21, %s1933_s21 }
  0x25   : > { %p1936_p1 = pnand %p1934_p12, %p1898_p0  ;;  %p1943_p5 = por %p1942_p4, %p1941_p8 }
  0x27   : > { %p1937_p2 = pneg %p1936_p1 }
  0x29   : > { %p1944_p3 = pnand %p1943_p5, %p1937_p2 }
  0x2b   : > { %1947 = shalt.err (!%p1944_p3)
}
  0x2c   : > { %1788 = dma.hbm_to_vmem [thread:$0]  (!%p2161_p13), %s2476_s4, 256, %s273_s25, [#allocation9], %s2036_s11, %s2036_s11, %s2037_s12  }
  0x2d   : > { %304 = sbr.rel (%p2149_p10) target bundleno = 2574 (0xa0e), region = 52 }
  0x32   : > { %1999 = dma.done.wait (%p2153_p11), [#allocation6], 256  }
  0x33   : > { %2001 = vsyncadd (%p2153_p11), [#allocation6], 4294967040 }
  0x34   : > { %2003 = dma.done.wait (%p2153_p11), [#allocation9], 256  }
  0x35   : > { %2005 = vsyncadd (%p2153_p11), [#allocation9], 4294967040  ;;  %p341_p4 = scmp.lt.s32.totalorder %s2024_s30, 1  ;;  %vm353_vm0 = vcmask 261120   ;;  %v1860_v3 = vld [vmem:[%s2474_s2 + $0x8] sm:$0xff]   ;;  %v2038_v5 = vmov 0.0   ;;  %v570_v51 = vlaneseq }
  0x36   : > { %v1862_v4 = vld [vmem:[%s2473_s1 + $0x8] sm:$0xff]   ;;  %1664 = vmatprep.subr.bf16.mxu0 %v2038_v5  ;;  %1672 = vmatprep.subr.bf16.mxu1 %v2038_v5  ;;  %v1861_v6 = vld [vmem:[%s2474_s2] sm:$0xff]   ;;  %vm2039_vm1 = vmmov 0   ;;  %vm430_vm2 = vcmask 60416   ;;  %s2040_s19 = smov 120   ;;  %vm592_vm3 = vcmask 64512  }
  0x37   : > { %s342_s22 = scalar_select %p341_p4, %s2024_s30, 1  ;;  %1665 = vmatpush3.bf16.msra.mxu0 %v1860_v3  ;;  %1673 = vmatpush3.bf16.msra.mxu1 %v1862_v4  ;;  %v1863_v7 = vld [vmem:[%s2473_s1] sm:$0xff]   ;;  %v575_v52 = vand.u32 127, %v570_v51  ;;  %v571_v55 = vshrl.u32 %v570_v51, 7 }
  0x38   : > { %1666 = vmatprep.subr.bf16.mxu0 %v2038_v5  ;;  %1668 = vmatprep.mubr.msk.bf16.mxu0 %vm2039_vm1, %v2038_v5  ;;  %v1589_v15 = vld [vmem:[%s2478_s6] ss:$0 sm:$0xff]  ;;  %s2042_s20 = smov 104   ;;  %s2043_s12 = smov 88  }
  0x39   : > { %s1588_s23 = sshll.u32 %s342_s22, 3  ;;  %1674 = vmatprep.subr.bf16.mxu1 %v2038_v5  ;;  %1676 = vmatprep.mubr.msk.bf16.mxu1 %vm2039_vm1, %v2038_v5  ;;  %v577_v53 = vcvt.s32.f32 %v575_v52  ;;  %vm2270_vm4 = vcmp.le.s32.totalorder %v575_v52, %v571_v55  ;;  %s2044_s14 = smov 96  }
  0x3a   : > { %s344_s11 = scalar_lea.vmem %s2472_s0, %s1588_s23  ;;  %s2045_s16 = smov 80  }
  0x3b   : > { %v2198_v0 = vld [vmem:[%s344_s11] sm:$0xff]  ;;  %1667 = vmatpush3.bf16.msra.mxu0 %v1861_v6  ;;  %1675 = vmatpush3.bf16.msra.mxu1 %v1863_v7  ;;  %s2041_s11 = smov 112   ;;  %v578_v54 = vmul.f32 1e+24, %v577_v53  ;;  %s2046_s21 = smov 72  }
  0x3c   : > { %v352_v1 = vmul.f32 %v2198_v0, %v2198_v0  ;;  %1680 = vmatprep.subr.bf16.mxu0 %v2038_v5  ;;  %1686 = vmatprep.subr.bf16.mxu1 %v2038_v5  ;;  %s1621_s26 = sshll.u32 %s2024_s30, 7  ;;  %p2489_p10 = scmp.ne.s32.totalorder %s2482_s15, 0 }
  0x3d   : > { %v579_v56 = vsub.f32 -1e+30, %v578_v54 }
  0x3e   : > { %v354_v2 = vsel %vm353_vm0, %v352_v1, 0.0 }
  0x3f   : > { %355 = vadd.xlane.f32.xlu0 %v354_v2 }
  0x43   : > { %475 = vadd.xlane.f32.xlu0 %v354_v2 }
  0xc8   : > { %v356_v8 = vpop.xlane.xlu0 %355 }
  0xc9   : > { %v358_v9 = vmul.f32 0.03125, %v356_v8 }
  0xcb   : > { %v359_v10 = vadd.f32 1e-06, %v358_v9 }
  0xcc   : > { %v476_v11 = vpop.xlane.xlu0 %475 }
  0xcd   : > { %1870 = vrsqrt.f32 %v359_v10  ;;  %v478_v12 = vmul.f32 0.03125, %v476_v11 }
  0xcf   : > { %v479_v13 = vadd.f32 1e-06, %v478_v12 }
  0xd1   : > { %1872 = vrsqrt.f32 %v479_v13 }
  0xda   : > { %v1871_v14 = vpop.eup %1870 }
  0xdb   : > { %v361_v16 = vmul.f32 %v1871_v14, %v2198_v0 }
  0xdd   : > { %v368_v17 = vmul.f32 %v1589_v15, %v361_v16 }
  0xde   : > { %v1873_v18 = vpop.eup %1872 }
  0xdf   : > { %v369_v19 = vpack.c.bf16 %v368_v17, %v368_v17  ;;  %v481_v20 = vmul.f32 %v1873_v18, %v2198_v0 }
  0xe1   : > { %1669 = vmatmul.mubr.msk.bf16.vlgmr.msra.gmra.mxu0 %vm353_vm0, %v369_v19  ;;  %v488_v21 = vmul.f32 %v1589_v15, %v481_v20 }
  0xe2   : > { %1682 = vmatprep.mubr.msk.bf16.mxu0 %vm2039_vm1, %v2038_v5 }
  0xe3   : > { %v489_v22 = vpack.c.bf16 %v488_v21, %v488_v21 }
  0xe5   : > { %1677 = vmatmul.mubr.msk.bf16.vlgmr.msra.gmra.mxu1 %vm353_vm0, %v489_v22 }
  0xe6   : > { %1688 = vmatprep.mubr.msk.bf16.mxu1 %vm2039_vm1, %v2038_v5 }
 0x1a1   : > { %v423_v23 = vpop.f32.mrf.mxu0 }
 0x1a2   : > { %v2236_v24 = vpack.c.bf16 %v423_v23, %v423_v23 }
 0x1a3   : > { %v1670_v25 = vpop.f32.mrf.mxu0 }
 0x1a4   : > { %431 = vst.msk [vmem:[#allocation2] sm:$0xf] %vm430_vm2, %v2236_v24  ;;  %439 = vrot.lane.b32.xlu1 %v2236_v24, %s2040_s19 }
 0x1a5   : > { %v426_v26 = vpop.f32.mrf.mxu0  ;;  %v543_v27 = vpop.f32.mrf.mxu1 }
 0x1a6   : > { %v549_v28 = vpack.c.bf16 %v543_v27, %v543_v27 }
 0x1a7   : > { %v1671_v29 = vpop.f32.mrf.mxu0  ;;  %v1678_v30 = vpop.f32.mrf.mxu1 }
 0x1a8   : > { %551 = vst.msk [vmem:[#allocation4] sm:$0xf] %vm430_vm2, %v549_v28  ;;  %449 = vrot.lane.b32.xlu1 %v2236_v24, %s2041_s11  ;;  %555 = vrot.lane.b32.xlu0 %v549_v28, %s2040_s19 }
 0x1a9   : > { %v546_v31 = vpop.f32.mrf.mxu1 }
 0x1ab   : > { %v1679_v32 = vpop.f32.mrf.mxu1  ;;  %v584_v33 = vld [vmem:[#allocation2] sm:$0xf] }
 0x1ac   : > { %459 = vrot.lane.b32.xlu1 %v2236_v24, %s2042_s20  ;;  %v597_v34 = vsel %vm592_vm3, %v584_v33, 0 }
 0x1ad   : > { %1681 = vmatpush3.bf16.xpose.msra.mxu0 %v597_v34 }
 0x1ae   : > { %1692 = vmatprep.subr.bf16.mxu0 %v2038_v5 }
 0x1af   : > { %v580_v35 = vld [vmem:[#allocation4] sm:$0xf] }
 0x1b0   : > { %560 = vrot.lane.b32.xlu1 %v549_v28, %s2041_s11  ;;  %s2425_s11 = scalar_lea.hbm %s2480_s8, %s1621_s26 }
 0x1b4   : > { %565 = vrot.lane.b32.xlu1 %v549_v28, %s2042_s20  ;;  %1683 = vmatmul.mubr.msk.bf16.vlgmr.msra.gmra.mxu0 %vm592_vm3, %v580_v35 }
 0x1b5   : > { %1694 = vmatprep.mubr.msk.bf16.mxu0 %vm2039_vm1, %v2038_v5 }
 0x216   : > { %v440_v36 = vpop.permute.xlu1 %439 }
 0x217   : > { %443 = vst.msk [vmem:[#allocation2 + $0x4] sm:$0xf] %vm430_vm2, %v440_v36 }
 0x21a   : > { %v450_v37 = vpop.permute.xlu1 %449  ;;  %v556_v38 = vpop.permute.xlu0 %555 }
 0x21b   : > { %453 = vst.msk [vmem:[#allocation2 + $0x8] sm:$0xf] %vm430_vm2, %v450_v37  ;;  %559 = vst.msk [vmem:[#allocation4 + $0x4] sm:$0xf] %vm430_vm2, %v556_v38 }
 0x21e   : > { %v460_v39 = vpop.permute.xlu1 %459  ;;  %v585_v40 = vld [vmem:[#allocation2 + $0x4] sm:$0xf] }
 0x21f   : > { %463 = vst.msk [vmem:[#allocation2 + $0xc] sm:$0xf] %vm430_vm2, %v460_v39  ;;  %v643_v41 = vsel %vm592_vm3, %v585_v40, 0 }
 0x220   : > { %1687 = vmatpush3.bf16.xpose.msra.mxu1 %v643_v41 }
 0x221   : > { %1698 = vmatprep.subr.bf16.mxu1 %v2038_v5 }
 0x222   : > { %v561_v42 = vpop.permute.xlu1 %560  ;;  %v586_v43 = vld [vmem:[#allocation2 + $0x8] sm:$0xf]  ;;  %v581_v45 = vld [vmem:[#allocation4 + $0x4] sm:$0xf] }
 0x223   : > { %564 = vst.msk [vmem:[#allocation4 + $0x8] sm:$0xf] %vm430_vm2, %v561_v42  ;;  %v689_v44 = vsel %vm592_vm3, %v586_v43, 0 }
 0x224   : > { %1693 = vmatpush3.bf16.xpose.msra.mxu0 %v689_v44 }
 0x225   : > { %1704 = vmatprep.subr.bf16.mxu0 %v2038_v5 }
 0x226   : > { %v566_v46 = vpop.permute.xlu1 %565  ;;  %v587_v47 = vld [vmem:[#allocation2 + $0xc] sm:$0xf] }
 0x227   : > { %569 = vst.msk [vmem:[#allocation4 + $0xc] sm:$0xf] %vm430_vm2, %v566_v46  ;;  %1689 = vmatmul.mubr.msk.bf16.vlgmr.msra.gmra.mxu1 %vm592_vm3, %v581_v45  ;;  %v735_v48 = vsel %vm592_vm3, %v587_v47, 0 }
 0x228   : > { %1699 = vmatpush3.bf16.xpose.msra.mxu1 %v735_v48  ;;  %1700 = vmatprep.mubr.msk.bf16.mxu1 %vm2039_vm1, %v2038_v5 }
 0x229   : > { %1710 = vmatprep.subr.bf16.mxu1 %v2038_v5 }
 0x22a   : > { %v582_v49 = vld [vmem:[#allocation4 + $0x8] sm:$0xf] }
 0x22b   : > { %1695 = vmatmul.mubr.msk.bf16.vlgmr.msra.gmra.mxu0 %vm592_vm3, %v582_v49 }
 0x22c   : > { %1706 = vmatprep.mubr.msk.bf16.mxu0 %vm2039_vm1, %v2038_v5 }
 0x22e   : > { %v583_v50 = vld [vmem:[#allocation4 + $0xc] sm:$0xf] }
 0x22f   : > { %1701 = vmatmul.mubr.msk.bf16.vlgmr.msra.gmra.mxu1 %vm592_vm3, %v583_v50 }
 0x230   : > { %1712 = vmatprep.mubr.msk.bf16.mxu1 %vm2039_vm1, %v2038_v5 }
 0x274   : > { %v633_v58 = vpop.f32.mrf.mxu0 }
 0x275   : > { %v777_v59 = vmul.f32 0.35355338, %v633_v58 }
 0x276   : > { %v1684_v60 = vpop.f32.mrf.mxu0 }
 0x277   : > { %v787_v61 = vsel %vm2270_vm4, %v777_v59, %v579_v56  ;;  %v2290_v26 = vsel %vm2270_vm4, %v777_v59, -inf }
 0x278   : > { %v636_v62 = vpop.f32.mrf.mxu0  ;;  %v791_v63 = vsel %vm592_vm3, %v787_v61, -inf }
 0x279   : > { %792 = vmax.xlane.f32.xlu1 %v791_v63 }
 0x27a   : > { %v1685_v1 = vpop.f32.mrf.mxu0 }
 0x2e7   : > { %v679_v2 = vpop.f32.mrf.mxu1 }
 0x2e8   : > { %v778_v3 = vmul.f32 0.35355338, %v679_v2 }
 0x2e9   : > { %v1690_v4 = vpop.f32.mrf.mxu1 }
 0x2ea   : > { %v788_v6 = vsel %vm2270_vm4, %v778_v3, %v579_v56  ;;  %v2299_v31 = vsel %vm2270_vm4, %v778_v3, -inf }
 0x2eb   : > { %v682_v7 = vpop.f32.mrf.mxu1  ;;  %v725_v8 = vpop.f32.mrf.mxu0  ;;  %v794_v9 = vsel %vm592_vm3, %v788_v6, -inf }
 0x2ec   : > { %v779_v10 = vmul.f32 0.35355338, %v725_v8  ;;  %795 = vmax.xlane.f32.xlu0 %v794_v9 }
 0x2ed   : > { %v1691_v11 = vpop.f32.mrf.mxu1  ;;  %v1696_v12 = vpop.f32.mrf.mxu0 }
 0x2ee   : > { %v789_v13 = vsel %vm2270_vm4, %v779_v10, %v579_v56  ;;  %v2308_v36 = vsel %vm2270_vm4, %v779_v10, -inf }
 0x2ef   : > { %v728_v14 = vpop.f32.mrf.mxu0  ;;  %v771_v15 = vpop.f32.mrf.mxu1  ;;  %v797_v16 = vsel %vm592_vm3, %v789_v13, -inf }
 0x2f0   : > { %v780_v17 = vmul.f32 0.35355338, %v771_v15  ;;  %798 = vmax.xlane.f32.xlu1 %v797_v16 }
 0x2f1   : > { %v1697_v18 = vpop.f32.mrf.mxu0  ;;  %v1702_v19 = vpop.f32.mrf.mxu1 }
 0x2f2   : > { %v790_v20 = vsel %vm2270_vm4, %v780_v17, %v579_v56  ;;  %v2317_v41 = vsel %vm2270_vm4, %v780_v17, -inf }
 0x2f3   : > { %v774_v21 = vpop.f32.mrf.mxu1  ;;  %v800_v22 = vsel %vm592_vm3, %v790_v20, -inf }
 0x2f4   : > { %801 = vmax.xlane.f32.xlu1 %v800_v22 }
 0x2f5   : > { %v1703_v23 = vpop.f32.mrf.mxu1 }
 0x302   : > { %v2286_v25 = vpop.xlane.xlu1 %792 }
 0x303   : > { %vm803_vm5 = vcmp.eq.f32.partialorder %v787_v61, %v2286_v25  ;;  %v883_v17 = vmax.f32 %v2286_v25, 0.0 }
 0x304   : > { %v807_v27 = vsel %vm803_vm5, %v2290_v26, 0.0  ;;  %v811_v28 = vsel %vm803_vm5, -inf, %v787_v61 }
 0x305   : > { %v815_v29 = vsel %vm592_vm3, %v811_v28, -inf }
 0x306   : > { %816 = vmax.xlane.f32.xlu0 %v815_v29 }
 0x375   : > { %v2295_v30 = vpop.xlane.xlu0 %795 }
 0x376   : > { %vm804_vm6 = vcmp.eq.f32.partialorder %v788_v6, %v2295_v30  ;;  %v884_v23 = vmax.f32 %v2295_v30, 0.0 }
 0x377   : > { %v808_v32 = vsel %vm804_vm6, %v2299_v31, 0.0  ;;  %v812_v33 = vsel %vm804_vm6, -inf, %v788_v6 }
 0x378   : > { %v818_v34 = vsel %vm592_vm3, %v812_v33, -inf }
 0x379   : > { %v2304_v35 = vpop.xlane.xlu1 %798  ;;  %819 = vmax.xlane.f32.xlu1 %v818_v34 }
 0x37a   : > { %vm805_vm7 = vcmp.eq.f32.partialorder %v789_v13, %v2304_v35  ;;  %v885_v29 = vmax.f32 %v2304_v35, 0.0 }
 0x37b   : > { %v809_v37 = vsel %vm805_vm7, %v2308_v36, 0.0  ;;  %v813_v38 = vsel %vm805_vm7, -inf, %v789_v13 }
 0x37c   : > { %v821_v39 = vsel %vm592_vm3, %v813_v38, -inf }
 0x37d   : > { %822 = vmax.xlane.f32.xlu0 %v821_v39  ;;  %v2313_v40 = vpop.xlane.xlu1 %801 }
 0x37e   : > { %vm806_vm8 = vcmp.eq.f32.partialorder %v790_v20, %v2313_v40 }
 0x37f   : > { %v810_v42 = vsel %vm806_vm8, %v2317_v41, 0.0  ;;  %v814_v43 = vsel %vm806_vm8, -inf, %v790_v20 }
 0x380   : > { %v824_v44 = vsel %vm592_vm3, %v814_v43, -inf }
 0x381   : > { %825 = vmax.xlane.f32.xlu1 %v824_v44 }
 0x38f   : > { %v817_v45 = vpop.xlane.xlu0 %816 }
 0x390   : > { %vm827_vm9 = vcmp.eq.f32.partialorder %v811_v28, %v817_v45 }
 0x391   : > { %v831_v46 = vsel %vm827_vm9, %v2290_v26, %v807_v27  ;;  %v835_v47 = vsel %vm827_vm9, -inf, %v811_v28  ;;  %vm926_vm9 = vcmask 1043456  }
 0x392   : > { %v839_v48 = vsel %vm592_vm3, %v835_v47, -inf }
 0x393   : > { %840 = vmax.xlane.f32.xlu0 %v839_v48 }
 0x402   : > { %v820_v49 = vpop.xlane.xlu1 %819 }
 0x403   : > { %vm828_vm10 = vcmp.eq.f32.partialorder %v812_v33, %v820_v49 }
 0x404   : > { %v832_v50 = vsel %vm828_vm10, %v2299_v31, %v808_v32  ;;  %v836_v51 = vsel %vm828_vm10, -inf, %v812_v33 }
 0x405   : > { %v842_v52 = vsel %vm592_vm3, %v836_v51, -inf }
 0x406   : > { %v823_v53 = vpop.xlane.xlu0 %822  ;;  %843 = vmax.xlane.f32.xlu1 %v842_v52 }
 0x407   : > { %vm829_vm11 = vcmp.eq.f32.partialorder %v813_v38, %v823_v53 }
 0x408   : > { %v833_v54 = vsel %vm829_vm11, %v2308_v36, %v809_v37  ;;  %v837_v55 = vsel %vm829_vm11, -inf, %v813_v38  ;;  %v886_v38 = vmax.f32 %v2313_v40, 0.0 }
 0x409   : > { %v845_v56 = vsel %vm592_vm3, %v837_v55, -inf }
 0x40a   : > { %846 = vmax.xlane.f32.xlu0 %v845_v56  ;;  %v826_v57 = vpop.xlane.xlu1 %825 }
 0x40b   : > { %vm830_vm12 = vcmp.eq.f32.partialorder %v814_v43, %v826_v57 }
 0x40c   : > { %v834_v58 = vsel %vm830_vm12, %v2317_v41, %v810_v42  ;;  %v838_v59 = vsel %vm830_vm12, -inf, %v814_v43 }
 0x40d   : > { %v848_v60 = vsel %vm592_vm3, %v838_v59, -inf }
 0x40e   : > { %849 = vmax.xlane.f32.xlu1 %v848_v60 }
 0x41c   : > { %v841_v61 = vpop.xlane.xlu0 %840 }
 0x41d   : > { %vm851_vm13 = vcmp.eq.f32.partialorder %v835_v47, %v841_v61 }
 0x41e   : > { %v855_v62 = vsel %vm851_vm13, %v2290_v26, %v831_v46  ;;  %v859_v63 = vsel %vm851_vm13, -inf, %v835_v47 }
 0x41f   : > { %v863_v1 = vsel %vm592_vm3, %v859_v63, -inf }
 0x420   : > { %864 = vmax.xlane.f32.xlu0 %v863_v1 }
 0x48f   : > { %v844_v2 = vpop.xlane.xlu1 %843 }
 0x490   : > { %vm852_vm14 = vcmp.eq.f32.partialorder %v836_v51, %v844_v2 }
 0x491   : > { %v856_v3 = vsel %vm852_vm14, %v2299_v31, %v832_v50  ;;  %v860_v4 = vsel %vm852_vm14, -inf, %v836_v51 }
 0x492   : > { %v866_v6 = vsel %vm592_vm3, %v860_v4, -inf }
 0x493   : > { %v847_v7 = vpop.xlane.xlu0 %846  ;;  %867 = vmax.xlane.f32.xlu1 %v866_v6 }
 0x494   : > { %vm853_vm15 = vcmp.eq.f32.partialorder %v837_v55, %v847_v7  ;;  %v1109_v7 = vld [vmem:[#allocation5] sm:$0xf] }
 0x495   : > { %v857_v8 = vsel %vm853_vm15, %v2308_v36, %v833_v54  ;;  %v861_v9 = vsel %vm853_vm15, -inf, %v837_v55 }
 0x496   : > { %v869_v10 = vsel %vm592_vm3, %v861_v9, -inf }
 0x497   : > { %870 = vmax.xlane.f32.xlu0 %v869_v10  ;;  %v850_v11 = vpop.xlane.xlu1 %849 }
 0x498   : > { %vm854_vm4 = vcmp.eq.f32.partialorder %v838_v59, %v850_v11 }
 0x499   : > { %v858_v12 = vsel %vm854_vm4, %v2317_v41, %v834_v58  ;;  %v862_v13 = vsel %vm854_vm4, -inf, %v838_v59 }
 0x49a   : > { %v872_v14 = vsel %vm592_vm3, %v862_v13, -inf }
 0x49b   : > { %873 = vmax.xlane.f32.xlu1 %v872_v14 }
 0x4a9   : > { %v865_v15 = vpop.xlane.xlu0 %864 }
 0x4aa   : > { %vm875_vm5 = vcmp.eq.f32.partialorder %v859_v63, %v865_v15 }
 0x4ab   : > { %v879_v16 = vsel %vm875_vm5, %v2290_v26, %v855_v62 }
 0x4ac   : > { %444 = vrot.lane.b32.xlu1 %v2236_v24, %s2043_s12  ;;  %v887_v18 = vsub.f32 %v879_v16, %v883_v17  ;;  %s2048_s12 = smov [#allocation10]  }
 0x4ad   : > { %435 = vrot.lane.b32.xlu0 %v2236_v24, %s2044_s14  ;;  %s1952_s14 = sshll.u32 %s2048_s12, 4  ;;  %s1953_s14 = int_to_ptr.vmem [resolvable:$false] %s1952_s14 }
 0x4ae   : > { %v891_v19 = vmul.f32 1.442695, %v887_v18 }
 0x4b0   : > { %1874 = vpow2.f32 %v891_v19 }
 0x4bd   : > { %v1875_v20 = vpop.eup %1874 }
 0x4be   : > { %v899_v21 = vsel %vm592_vm3, %v1875_v20, 0.0 }
 0x4cc   : > { %900 = vadd.xlane.f32.xlu0 %v899_v21 }
 0x51c   : > { %v868_v22 = vpop.xlane.xlu1 %867 }
 0x51d   : > { %vm876_vm6 = vcmp.eq.f32.partialorder %v860_v4, %v868_v22 }
 0x51e   : > { %v880_v26 = vsel %vm876_vm6, %v2299_v31, %v856_v3  ;;  %v1112_v3 = vld [vmem:[#allocation5 + $0x4] sm:$0xf] }
 0x51f   : > { %v888_v27 = vsub.f32 %v880_v26, %v884_v23  ;;  %v1117_v10 = vsel %vm926_vm9, %v1112_v3, 0 }
 0x520   : > { %v871_v28 = vpop.xlane.xlu0 %870 }
 0x521   : > { %v893_v32 = vmul.f32 1.442695, %v888_v27  ;;  %vm877_vm7 = vcmp.eq.f32.partialorder %v861_v9, %v871_v28 }
 0x522   : > { %v881_v25 = vsel %vm877_vm7, %v2308_v36, %v857_v8 }
 0x523   : > { %1876 = vpow2.f32 %v893_v32  ;;  %v889_v33 = vsub.f32 %v881_v25, %v885_v29 }
 0x524   : > { %v436_v34 = vpop.permute.xlu0 %435  ;;  %v874_v37 = vpop.xlane.xlu1 %873 }
 0x525   : > { %v895_v39 = vmul.f32 1.442695, %v889_v33  ;;  %438 = vst.msk [vmem:[#allocation3] sm:$0xf] %vm430_vm2, %v436_v34  ;;  %vm878_vm8 = vcmp.eq.f32.partialorder %v862_v13, %v874_v37  ;;  %v1257_v13 = vld [vmem:[#allocation5 + $0xc] sm:$0xf] }
 0x526   : > { %v882_v30 = vsel %vm878_vm8, %v2317_v41, %v858_v12  ;;  %v1163_v12 = vsel %vm926_vm9, %v1109_v7, 0  ;;  %v1262_v16 = vsel %vm926_vm9, %v1257_v13, 0  ;;  %v1867_v7 = vld [vmem:[%s2477_s5 + $0x10] sm:$0xff]  }
 0x527   : > { %1878 = vpow2.f32 %v895_v39  ;;  %v890_v31 = vsub.f32 %v882_v30, %v886_v38 }
 0x528   : > { %v445_v42 = vpop.permute.xlu1 %444 }
 0x529   : > { %v897_v35 = vmul.f32 1.442695, %v890_v31  ;;  %448 = vst.msk [vmem:[#allocation3 + $0x4] sm:$0xf] %vm430_vm2, %v445_v42 }
 0x52b   : > { %1880 = vpow2.f32 %v897_v35 }
 0x52c   : > { %v588_v36 = vld [vmem:[#allocation3] sm:$0xf] }
 0x52d   : > { %v928_v43 = vsel %vm926_vm9, %v588_v36, 0 }
 0x52e   : > { %1705 = vmatpush3.bf16.msra.mxu0 %v928_v43 }
 0x52f   : > { %1716 = vmatprep.subr.bf16.mxu0 %v2038_v5 }
 0x530   : > { %v1877_v40 = vpop.eup %1876  ;;  %v589_v44 = vld [vmem:[#allocation3 + $0x4] sm:$0xf] }
 0x531   : > { %v902_v45 = vsel %vm592_vm3, %v1877_v40, 0.0  ;;  %v974_v41 = vsel %vm926_vm9, %v589_v44, 0 }
 0x532   : > { %903 = vadd.xlane.f32.xlu1 %v902_v45  ;;  %1711 = vmatpush3.bf16.msra.mxu1 %v974_v41 }
 0x533   : > { %1722 = vmatprep.subr.bf16.mxu1 %v2038_v5 }
 0x534   : > { %v1879_v46 = vpop.eup %1878 }
 0x535   : > { %v905_v47 = vsel %vm592_vm3, %v1879_v46, 0.0 }
 0x536   : > { %906 = vadd.xlane.f32.xlu0 %v905_v47 }
 0x538   : > { %v1881_v48 = vpop.eup %1880 }
 0x539   : > { %v908_v49 = vsel %vm592_vm3, %v1881_v48, 0.0 }
 0x53a   : > { %909 = vadd.xlane.f32.xlu1 %v908_v49 }
 0x54b   : > { %454 = vrot.lane.b32.xlu1 %v2236_v24, %s2045_s16  ;;  %s2047_s16 = smov 64  }
 0x54c   : > { %464 = vrot.lane.b32.xlu0 %v2236_v24, %s2046_s21  ;;  %s338_s21 = sand.u32 1, %s2016_s28  }
 0x54d   : > { %s1587_s24 = sshll.u32 %s338_s21, 3  ;;  %s1474_s20 = scalar_lea.sflag [#allocation7], %s338_s21 }
 0x54e   : > { %s340_s22 = scalar_lea.vmem [#allocation10], %s1587_s24 }
 0x54f   : > { %s1488_s23 = sshll.u32 %s340_s22, 4  ;;  %s2427_s23 = int_to_ptr.vmem [resolvable:$true] %s1488_s23 }
 0x550   : > { %s1948_s30 = scalar_lea.vmem %s2427_s23, 128  ;;  %p1955_p0 = scmp.lt.s32.totalorder %s2427_s23, %s1953_s14 }
 0x551   : > { %p1949_p8 = scmp.ne.s32.totalorder %s2427_s23, %s1948_s30 }
 0x553   : > { %p1950_p11 = pnand %p1949_p8, %p2489_p10 }
 0x555   : > { %v901_v50 = vpop.xlane.xlu0 %900  ;;  %p1951_p13 = pneg %p1950_p11 }
 0x556   : > { %1882 = vrcp.f32 %v901_v50 }
 0x563   : > { %v1883_v51 = vpop.eup %1882 }
 0x564   : > { %v915_v52 = vmul.f32 %v1883_v51, %v1875_v20  ;;  %v1207_v20 = vld [vmem:[#allocation5 + $0x8] sm:$0xf] }
 0x565   : > { %v1212_v23 = vsel %vm926_vm9, %v1207_v20, 0 }
 0x566   : > { %v919_v53 = vpack.c.bf16 %v915_v52, %v915_v52 }
 0x568   : > { %1707 = vmatmul.mubr.msk.bf16.vlgmr.msra.gmra.mxu0 %vm592_vm3, %v919_v53 }
 0x569   : > { %1718 = vmatprep.mubr.msk.bf16.mxu0 %vm2039_vm1, %v2038_v5 }
 0x5bb   : > { %v904_v54 = vpop.xlane.xlu1 %903 }
 0x5bc   : > { %1884 = vrcp.f32 %v904_v54 }
 0x5bf   : > { %v907_v55 = vpop.xlane.xlu0 %906 }
 0x5c0   : > { %1886 = vrcp.f32 %v907_v55 }
 0x5c3   : > { %v465_v56 = vpop.permute.xlu0 %464  ;;  %v910_v57 = vpop.xlane.xlu1 %909 }
 0x5c4   : > { %468 = vst.msk [vmem:[#allocation3 + $0xc] sm:$0xf] %vm430_vm2, %v465_v56  ;;  %1888 = vrcp.f32 %v910_v57 }
 0x5c7   : > { %v455_v24 = vpop.permute.xlu1 %454 }
 0x5c8   : > { %458 = vst.msk [vmem:[#allocation3 + $0x8] sm:$0xf] %vm430_vm2, %v455_v24 }
 0x5c9   : > { %v1885_v58 = vpop.eup %1884 }
 0x5ca   : > { %v916_v59 = vmul.f32 %v1885_v58, %v1877_v40 }
 0x5cb   : > { %v591_v60 = vld [vmem:[#allocation3 + $0xc] sm:$0xf] }
 0x5cc   : > { %v920_v61 = vpack.c.bf16 %v916_v59, %v916_v59  ;;  %v1066_v62 = vsel %vm926_vm9, %v591_v60, 0  ;;  %v1864_v59 = vld [vmem:[#allocation8 + $0x8] sm:$0xff]   ;;  %v1865_v60 = vld [vmem:[#allocation8] sm:$0xff]  }
 0x5cd   : > { %v1887_v63 = vpop.eup %1886 }
 0x5ce   : > { %1713 = vmatmul.mubr.msk.bf16.vlgmr.msra.gmra.mxu1 %vm592_vm3, %v920_v61  ;;  %v917_v1 = vmul.f32 %v1887_v63, %v1879_v46 }
 0x5cf   : > { %1723 = vmatpush3.bf16.msra.mxu1 %v1066_v62  ;;  %v590_v2 = vld [vmem:[#allocation3 + $0x8] sm:$0xf]  ;;  %1724 = vmatprep.mubr.msk.bf16.mxu1 %vm2039_vm1, %v2038_v5 }
 0x5d0   : > { %v1020_v4 = vsel %vm926_vm9, %v590_v2, 0  ;;  %1734 = vmatprep.subr.bf16.mxu1 %v2038_v5  ;;  %v921_v8 = vpack.c.bf16 %v917_v1, %v917_v1 }
 0x5d1   : > { %v1889_v6 = vpop.eup %1888  ;;  %1717 = vmatpush3.bf16.msra.mxu0 %v1020_v4 }
 0x5d2   : > { %v918_v9 = vmul.f32 %v1889_v6, %v1881_v48  ;;  %1728 = vmatprep.subr.bf16.mxu0 %v2038_v5  ;;  %v1866_v6 = vld [vmem:[%s2477_s5 + $0x18] sm:$0xff]  }
 0x5d4   : > { %1719 = vmatmul.mubr.msk.bf16.vlgmr.msra.gmra.mxu0 %vm592_vm3, %v921_v8  ;;  %v922_v11 = vpack.c.bf16 %v918_v9, %v918_v9  ;;  %v1868_v8 = vld [vmem:[%s2477_s5 + $0x8] sm:$0xff]   ;;  %v1869_v9 = vld [vmem:[%s2477_s5] sm:$0xff]  }
 0x5d5   : > { %1729 = vmatpush3.bf16.msra.mxu0 %v1117_v10  ;;  %1730 = vmatprep.mubr.msk.bf16.mxu0 %vm2039_vm1, %v2038_v5 }
 0x5d6   : > { %1725 = vmatmul.mubr.msk.bf16.vlgmr.msra.gmra.mxu1 %vm592_vm3, %v922_v11  ;;  %1740 = vmatprep.subr.bf16.mxu0 %v2038_v5 }
 0x5d7   : > { %1735 = vmatpush3.bf16.msra.mxu1 %v1163_v12  ;;  %1736 = vmatprep.mubr.msk.bf16.mxu1 %vm2039_vm1, %v2038_v5 }
 0x5d8   : > { %1746 = vmatprep.subr.bf16.mxu1 %v2038_v5 }
 0x628   : > { %v964_v14 = vpop.f32.mrf.mxu0 }
 0x629   : > { %v1108_v15 = vpack.c.bf16 %v964_v14, %v964_v14 }
 0x62a   : > { %v1708_v17 = vpop.f32.mrf.mxu0 }
 0x62b   : > { %1737 = vmatmul.mubr.msk.bf16.vlgmr.msra.gmra.mxu1 %vm592_vm3, %v1108_v15 }
 0x62c   : > { %v967_v18 = vpop.f32.mrf.mxu0  ;;  %1747 = vmatpush3.bf16.msra.mxu1 %v1262_v16  ;;  %1748 = vmatprep.mubr.msk.bf16.mxu1 %vm2039_vm1, %v2038_v5 }
 0x62d   : > { %1760 = vmatprep.subr.bf16.mxu1 %v2038_v5 }
 0x62e   : > { %v1709_v19 = vpop.f32.mrf.mxu0 }
 0x68e   : > { %v1010_v21 = vpop.f32.mrf.mxu1 }
 0x68f   : > { %v1110_v22 = vpack.c.bf16 %v1010_v21, %v1010_v21 }
 0x690   : > { %v1714_v26 = vpop.f32.mrf.mxu1 }
 0x691   : > { %1731 = vmatmul.mubr.msk.bf16.vlgmr.msra.gmra.mxu0 %vm592_vm3, %v1110_v22 }
 0x692   : > { %v1013_v27 = vpop.f32.mrf.mxu1  ;;  %1741 = vmatpush3.bf16.msra.mxu0 %v1212_v23  ;;  %1742 = vmatprep.mubr.msk.bf16.mxu0 %vm2039_vm1, %v2038_v5 }
 0x693   : > { %1752 = vmatprep.subr.bf16.mxu0 %v2038_v5 }
 0x694   : > { %v1715_v28 = vpop.f32.mrf.mxu1  ;;  %v1056_v29 = vpop.f32.mrf.mxu0 }
 0x695   : > { %v1205_v33 = vpack.c.bf16 %v1056_v29, %v1056_v29 }
 0x696   : > { %v1720_v32 = vpop.f32.mrf.mxu0  ;;  %v1102_v25 = vpop.f32.mrf.mxu1 }
 0x697   : > { %v1255_v34 = vpack.c.bf16 %v1102_v25, %v1102_v25 }
 0x698   : > { %v1059_v37 = vpop.f32.mrf.mxu0  ;;  %v1726_v38 = vpop.f32.mrf.mxu1 }
 0x699   : > { %1743 = vmatmul.mubr.msk.bf16.vlgmr.msra.gmra.mxu0 %vm592_vm3, %v1205_v33  ;;  %1749 = vmatmul.mubr.msk.bf16.vlgmr.msra.gmra.mxu1 %vm592_vm3, %v1255_v34 }
 0x69a   : > { %v1721_v39 = vpop.f32.mrf.mxu0  ;;  %v1105_v30 = vpop.f32.mrf.mxu1  ;;  %1756 = vmatprep.mubr.msk.bf16.mxu0 %vm2039_vm1, %v2038_v5  ;;  %1768 = vmatprep.mubr.msk.bf16.mxu1 %vm2039_vm1, %v2038_v5  ;;  %vm1427_vm1 = vcmask 523264  }
 0x69b   : > { %1753 = vmatpush3.bf16.msra.mxu0 %v1864_v59  ;;  %1761 = vmatpush3.bf16.msra.mxu1 %v1866_v6 }
 0x69c   : > { %v1727_v31 = vpop.f32.mrf.mxu1  ;;  %1754 = vmatprep.subr.bf16.mxu0 %v2038_v5  ;;  %1762 = vmatprep.subr.bf16.mxu1 %v2038_v5 }
 0x69f   : > { %1755 = vmatpush3.bf16.msra.mxu0 %v1865_v60  ;;  %1763 = vmatpush3.bf16.msra.mxu1 %v1867_v7 }
 0x6a0   : > { %1764 = vmatprep.subr.bf16.mxu1 %v2038_v5 }
 0x6a3   : > { %1765 = vmatpush3.bf16.msra.mxu1 %v1868_v8 }
 0x6a4   : > { %1766 = vmatprep.subr.bf16.mxu1 %v2038_v5 }
 0x6a7   : > { %1767 = vmatpush3.bf16.msra.mxu1 %v1869_v9 }
 0x6eb   : > { %v1199_v42 = vpop.f32.mrf.mxu1 }
 0x6ed   : > { %v1738_v35 = vpop.f32.mrf.mxu1 }
 0x6ef   : > { %v1202_v36 = vpop.f32.mrf.mxu1 }
 0x6f1   : > { %v1739_v43 = vpop.f32.mrf.mxu1 }
 0x751   : > { %v1153_v40 = vpop.f32.mrf.mxu0 }
 0x752   : > { %v1200_v46 = vadd.f32 %v1199_v42, %v1153_v40 }
 0x753   : > { %v1732_v44 = vpop.f32.mrf.mxu0 }
 0x755   : > { %v1156_v45 = vpop.f32.mrf.mxu0 }
 0x757   : > { %v1733_v41 = vpop.f32.mrf.mxu0 }
 0x759   : > { %v1248_v47 = vpop.f32.mrf.mxu0  ;;  %v1298_v48 = vpop.f32.mrf.mxu1 }
 0x75a   : > { %v1254_v49 = vadd.f32 %v1248_v47, %v1200_v46 }
 0x75b   : > { %v1744_v50 = vpop.f32.mrf.mxu0  ;;  %v1750_v51 = vpop.f32.mrf.mxu1 }
 0x75c   : > { %v1304_v52 = vadd.f32 %v1298_v48, %v1254_v49 }
 0x75d   : > { %v1251_v53 = vpop.f32.mrf.mxu0  ;;  %v1301_v54 = vpop.f32.mrf.mxu1 }
 0x75e   : > { %v1305_v55 = vadd.f32 %v1304_v52, %v2198_v0  ;;  %v1611_v0 = vld [vmem:[%s2479_s7] ss:$0 sm:$0xff] }
 0x75f   : > { %v1745_v56 = vpop.f32.mrf.mxu0  ;;  %v1751_v57 = vpop.f32.mrf.mxu1 }
 0x760   : > { %v1307_v24 = vmul.f32 %v1305_v55, %v1305_v55 }
 0x762   : > { %v1308_v58 = vsel %vm353_vm0, %v1307_v24, 0.0 }
 0x763   : > { %1309 = vadd.xlane.f32.xlu1 %v1308_v58 }
 0x7ec   : > { %v1310_v61 = vpop.xlane.xlu1 %1309 }
 0x7ed   : > { %v1311_v62 = vmul.f32 0.03125, %v1310_v61 }
 0x7ef   : > { %v1312_v63 = vadd.f32 1e-06, %v1311_v62 }
 0x7f1   : > { %1890 = vrsqrt.f32 %v1312_v63 }
 0x7fe   : > { %v1891_v1 = vpop.eup %1890 }
 0x7ff   : > { %v1314_v2 = vmul.f32 %v1891_v1, %v1305_v55 }
 0x801   : > { %v1321_v3 = vmul.f32 %v1611_v0, %v1314_v2 }
 0x803   : > { %v1322_v4 = vpack.c.bf16 %v1321_v3, %v1321_v3 }
 0x805   : > { %1757 = vmatmul.mubr.msk.bf16.vlgmr.msra.gmra.mxu0 %vm353_vm0, %v1322_v4 }
 0x8c5   : > { %v1376_v10 = vpop.f32.mrf.mxu0 }
 0x8c6   : > { %1390 = vrot.lane.b32.xlu0 %v1376_v10, %s2047_s16  ;;  %v1382_v14 = vsub.f32 0.0, %v1376_v10  ;;  %s1954_s16 = scalar_lea.vmem %s1953_s14, 256 }
 0x8c7   : > { %v1758_v11 = vpop.f32.mrf.mxu0  ;;  %p1956_p6 = scmp.lt.s32.totalorder %s1954_s16, %s1948_s30 }
 0x8c8   : > { %v1383_v15 = vmul.f32 1.442695, %v1382_v14 }
 0x8c9   : > { %v1379_v12 = vpop.f32.mrf.mxu0  ;;  %p1957_p7 = por %p1956_p6, %p1955_p0 }
 0x8ca   : > { %1892 = vpow2.f32 %v1383_v15 }
 0x8cb   : > { %v1759_v13 = vpop.f32.mrf.mxu0  ;;  %p1958_p9 = pnand %p1957_p7, %p1951_p13 }
 0x8d7   : > { %v1893_v16 = vpop.eup %1892 }
 0x8d8   : > { %v1385_v17 = vadd.f32 1.0, %v1893_v16 }
 0x8da   : > { %1894 = vrcp.f32 %v1385_v17 }
 0x8e7   : > { %v1895_v5 = vpop.eup %1894 }
 0x8e8   : > { %v1388_v18 = vmul.f32 %v1895_v5, %v1376_v10 }
 0x938   : > { %v1391_v19 = vpop.permute.xlu0 %1390 }
 0x939   : > { %v1393_v20 = vmul.f32 %v1391_v19, %v1388_v18 }
 0x93b   : > { %v1394_v21 = vpack.c.bf16 %v1393_v20, %v1393_v20 }
 0x93d   : > { %1769 = vmatmul.mubr.msk.bf16.vlgmr.msra.gmra.mxu1 %vm1427_vm1, %v1394_v21 }
 0x9fd   : > { %v1465_v22 = vpop.f32.mrf.mxu1 }
 0x9fe   : > { %v1471_v23 = vadd.f32 %v1465_v22, %v1305_v55 }
 0x9ff   : > { %v1770_v26 = vpop.f32.mrf.mxu1 }
 0xa00   : > { %1472 = vst.msk [vmem:[%s340_s22] sm:$0xff] %vm353_vm0, %v1471_v23 }
 0xa01   : > { %v1468_v27 = vpop.f32.mrf.mxu1 }
 0xa02   : > { %1961 = shalt.err (!%p1958_p9)
}
 0xa03   : > { %s1962_s24 = scalar_lea.hbm %s2425_s11, 128  ;;  %s1966_s22 = scalar_lea.hbm %s2480_s8, 256 }
 0xa04   : > { %p1963_p12 = scmp.ne.s32.totalorder %s2425_s11, %s1962_s24  ;;  %p1967_p5 = scmp.lt.s32.totalorder %s2425_s11, %s2480_s8 }
 0xa05   : > { %p1968_p3 = scmp.lt.s32.totalorder %s1966_s22, %s1962_s24 }
 0xa06   : > { %p1964_p1 = pnand %p1963_p12, %p2489_p10 }
 0xa07   : > { %p1969_p4 = por %p1968_p3, %p1967_p5 }
 0xa08   : > { %p1965_p2 = pneg %p1964_p1 }
 0xa0a   : > { %p1970_p8 = pnand %p1969_p4, %p1965_p2 }
 0xa0c   : > { %1973 = shalt.err (!%p1970_p8)
}
 0xa0d   : > { %1780 = dma.vmem_to_hbm [thread:$0]  (%p2489_p10), %s2427_s23, 128, %s2425_s11, %s1474_s20   ;;  %v1771_v28 = vpop.f32.mrf.mxu1 }
 0xa0e PF: > { %p1797_p11 = scmp.ge.s32.totalorder %s2032_s10, 2  ;;  %s1500_s30 = sand.u32 1, %s2012_s27  }
 0xa0f   : > { %p2490_p13 = scmp.ne.s32.totalorder %s2483_s17, 0  ;;  %s1501_s12 = scalar_lea.sflag [#allocation7], %s1500_s30 }
 0xa11   : > { %p1790_p0 = pnand %p1797_p11, %p2490_p13 }
 0xa13   : > { %p1791_p6 = pneg %p1790_p0 }
 0xa15   : > { %2007 = dma.done.wait (%p1791_p6), %s1501_s12, 128  }
 0xa16   : > { %2009 = vsyncadd (%p1791_p6), %s1501_s12, 4294967168  ;;  %s23_s10 = sadd.s32 1, %s2032_s10   ;;  %s2491_s27 = smov %s2016_s28 }
 0xa17   : > { %p20_p7 = scmp.ge.s32.totalorder %s23_s10, 4   ;;  %s2492_s28 = smov %s2020_s29 }
 0xa18   : > { %s2493_s29 = smov %s2147_s18  ;;  %s2494_s30 = smov %s2028_s9 }
 0xa19   : > { %s2495_s9 = smov %s2497_s13  ;;  %22 = sbr.rel (!%p20_p7) target bundleno = 6 (0x6), region = 112 }
 0xa1e   :  { %1506 = vsyncpa [#allocation6], 1 }
 0xa1f   :  { %1508 = vsyncpa [#allocation6 + $0x1], 1 }
 0xa20   :  { %1509 = vsyncpa [#allocation9], 1 }
 0xa21   :  { %1510 = vsyncpa [#allocation7], 1 }
 0xa22   :  { %1512 = vsyncpa [#allocation7 + $0x1], 1 }

</bundles_post_ra>
